<compile_context>
chip_gen: v5e
topology: v5e:2x2
jax: 0.10.0
libtpu: 0.0.40
codegen_flags: <defaults>
</compile_context>

<pallas_src>
import jax
import jax.numpy as jnp
import numpy as np
from jax.experimental import pallas as pl
from jax.experimental.pallas import tpu as pltpu

PAD_token = 0  # padding_idx for the embedding tables (embedding row is zero)


def make_encoder_memnn_kernel(max_hops, embed_dim):
    """Pallas kernel body for a fixed (static) number of hops / embed dim."""
    H, E = max_hops, embed_dim

    def kernel(counts_ref, emb_ref, out_ref, acc_ref):
        # counts_ref: (tB, M, tV)   bf16   bag-of-words counts (one V tile)
        # emb_ref:    (tV, Npad)    bf16   stacked tables C_0..C_H (one V tile)
        # out_ref:    (tB, (H+1)*E) f32    u_0 .. u_H packed along lanes
        # acc_ref:    (tB*M, Npad)  f32    accumulator over the V reduction
        k = pl.program_id(1)
        nk = pl.num_programs(1)
        tB, M, tV = counts_ref.shape

        @pl.when(k == 0)
        def _zero_acc():
            acc_ref[...] = jnp.zeros_like(acc_ref)

        # m_all += counts @ [C_0 | C_1 | ... | C_H]   (single fused MXU matmul)
        c2d = counts_ref[...].reshape(tB * M, tV)
        acc_ref[...] += jnp.dot(c2d, emb_ref[...],
                                preferred_element_type=jnp.float32)

        @pl.when(k == nk - 1)
        def _epilogue():
            m_all = acc_ref[...]                              # (tB*M, Npad)
            u = jnp.zeros((tB, E), dtype=jnp.float32)
            hop_outs = [u]                                    # u_0 = 0
            for hop in range(H):                              # static unroll
                m_A = m_all[:, hop * E:(hop + 1) * E].reshape(tB, M, E)
                m_C = m_all[:, (hop + 1) * E:(hop + 2) * E].reshape(tB, M, E)
                # prob = softmax over memory axis of <m_A, u>
                logits = jnp.sum(m_A * u[:, None, :], axis=2)         # (tB, M)
                logits = logits - jnp.max(logits, axis=1, keepdims=True)
                p = jnp.exp(logits)
                p = p * pl.reciprocal(jnp.sum(p, axis=1, keepdims=True),
                                      approx=True)
                # o_k = sum_M m_C * prob ;  u_{k+1} = u_k + o_k
                o_k = jnp.sum(m_C * p[:, :, None], axis=1)            # (tB, E)
                u = u + o_k
                hop_outs.append(u)
            # single lane-dense writeback of all hop states
            out_ref[...] = jnp.concatenate(hop_outs, axis=-1)

    return kernel


class EncoderMemNNPallas:
    """JAX/Pallas re-implementation of EncoderMemNN.forward (eval mode)."""

    def __init__(self, vocab, embedding_dim, hop, dropout, unk_mask, key,
                 batch_tile=8, vocab_tile=128):
        self.num_vocab = vocab
        self.embedding_dim = embedding_dim
        self.max_hops = hop
        self.dropout = dropout
        self.unk_mask = unk_mask
        self.batch_tile = batch_tile
        self.vocab_tile = vocab_tile

        # Embedding tables C_0 .. C_hop ~ N(0, 0.1), padding row zeroed.
        embs = 0.1 * jax.random.normal(
            key, (hop + 1, vocab, embedding_dim), dtype=jnp.float32)
        self.embs = embs.at[:, PAD_token, :].set(0.0)

        # Stack tables column-wise -> (V, (H+1)*E); pad V/N to tile multiples.
        N = (hop + 1) * embedding_dim
        Vp = pl.cdiv(vocab, vocab_tile) * vocab_tile
        Np = pl.cdiv(N, 128) * 128
        stacked = jnp.transpose(self.embs, (1, 0, 2)).reshape(vocab, N)
        stacked = jnp.pad(stacked, ((0, Vp - vocab), (0, Np - N)))
        self.emb_stacked = stacked.astype(jnp.bfloat16)     # (Vp, Np) bf16
        self.n_cols, self.Vp, self.Np = N, Vp, Np

    def __call__(self, story):
        # story: (M, B, W) int32 (same layout the PyTorch module receives)
        story = jnp.transpose(story, (1, 0, 2))              # (B, M, W)
        B, M, W = story.shape
        E, H = self.embedding_dim, self.max_hops
        Vp, Np, N = self.Vp, self.Np, self.n_cols

        # Batch tiling (pad B up to a tile multiple if needed).
        if B <= self.batch_tile:
            tB, Bp = B, B
        else:
            tB = self.batch_tile
            Bp = pl.cdiv(B, tB) * tB
        tV = self.vocab_tile

        # Bag-of-words counts via scatter-add (no dense one-hot intermediate).
        story2d = story.reshape(B * M, W)
        rows = jnp.arange(B * M, dtype=jnp.int32)[:, None]
        counts = jnp.zeros((B * M, Vp), jnp.float32)
        counts = counts.at[rows, story2d].add(1.0)
        counts = counts.reshape(B, M, Vp)
        if Bp > B:
            counts = jnp.pad(counts, ((0, Bp - B), (0, 0), (0, 0)))
        counts = counts.astype(jnp.bfloat16)                 # exact: small ints

        grid = (Bp // tB, Vp // tV)
        u_flat = pl.pallas_call(
            make_encoder_memnn_kernel(H, E),
            out_shape=jax.ShapeDtypeStruct((Bp, N), jnp.float32),
            grid_spec=pltpu.PrefetchScalarGridSpec(
                num_scalar_prefetch=0,
                grid=grid,
                in_specs=[
                    pl.BlockSpec((tB, M, tV), lambda b, k: (b, 0, k)),
                    pl.BlockSpec((tV, Np), lambda b, k: (k, 0)),
                ],
                out_specs=pl.BlockSpec((tB, N), lambda b, k: (b, 0)),
                scratch_shapes=[pltpu.VMEM((tB * M, Np), jnp.float32)],
            ),
            compiler_params=pltpu.CompilerParams(
                dimension_semantics=("parallel", "arbitrary"),
                vmem_limit_bytes=32 * 1024 * 1024,
            ),
        )(counts, self.emb_stacked)

        u_flat = u_flat[:B]                                  # drop batch pad
        u_list = [u_flat[:, h * E:(h + 1) * E] for h in range(H + 1)]
        return u_list[-1], u_list


def jax_reference(story, embs, max_hops):
    """Pure-JAX reference mirroring the PyTorch forward (eval mode, f32)."""
    story = jnp.transpose(story, (1, 0, 2))                  # (B, M, W)
    B = story.shape[0]
    E = embs.shape[-1]
    u = jnp.zeros((B, E), dtype=jnp.float32)
    for hop in range(max_hops):
        embed_A = embs[hop][story]                           # (B, M, W, E)
        m_A = embed_A.sum(axis=2)                            # (B, M, E)
        logits = (m_A * u[:, None, :]).sum(axis=2)           # (B, M)
        prob = jax.nn.softmax(logits, axis=1)
        embed_C = embs[hop + 1][story]
        m_C = embed_C.sum(axis=2)
        o_k = (m_C * prob[:, :, None]).sum(axis=1)           # (B, E)
        u = u + o_k
    return u


if __name__ == "__main__":
    key = jax.random.PRNGKey(0)
    k_emb, k_story = jax.random.split(key)

    # Small but grid-exercising shapes: vocab=512 (4 V tiles), embed=32,
    # hops=3 -> (H+1)*E = 128 lane-dense, batch=16 (2 B tiles), memories=8.
    VOCAB, EMBED, HOPS = 512, 32, 3
    M, B, W = 8, 16, 6

    enc = EncoderMemNNPallas(VOCAB, EMBED, HOPS, dropout=0.1, unk_mask=True,
                             key=k_emb)

    # story in PyTorch layout (M, B, W); include some PAD tokens (= 0).
    story = jax.random.randint(k_story, (M, B, W), 0, VOCAB, dtype=jnp.int32)
    story = story.at[:, :, -1].set(PAD_token)                # trailing padding

    u_k, u_list = enc(story)
    u_k = jax.block_until_ready(u_k)

    # Cross-check against the pure-JAX (gather-based, f32) reference.
    u_ref = jax_reference(story, enc.embs, HOPS)
    np.testing.assert_allclose(np.asarray(u_k), np.asarray(u_ref),
                               rtol=2e-2, atol=5e-3)
    assert len(u_list) == HOPS + 1
    assert u_list[0].shape == (B, EMBED)
    assert np.allclose(np.asarray(u_list[0]), 0.0)

    print("KERNEL_OK")
</pallas_src>

<mosaic_0001>
module attributes {stable_mosaic.version = 11 : i64} {
  func.func @kernel(%arg0: i32, %arg1: i32, %arg2: memref<8x8x128xbf16, #tpu.memory_space<vmem>>, %arg3: memref<128x128xbf16, #tpu.memory_space<vmem>>, %arg4: memref<8x128xf32, #tpu.memory_space<vmem>>, %arg5: memref<64x128xf32, #tpu.memory_space<vmem>>) attributes {dimension_semantics = [#tpu.dimension_semantics<parallel>, #tpu.dimension_semantics<arbitrary>], iteration_bounds = array<i64: 2, 4>, scalar_prefetch = 0 : i64, scratch_operands = 1 : i64, tpu.core_type = #tpu.core_type<tc>, window_params = [{transform_indices = @transform_0, window_bounds = array<i64: 8, 8, 128>}, {transform_indices = @transform_1, window_bounds = array<i64: 128, 128>}, {transform_indices = @transform_2, window_bounds = array<i64: 8, 128>}]} {
    %c0_i32 = arith.constant 0 : i32
    %0 = arith.cmpi eq, %arg1, %c0_i32 : i32
    %1 = arith.extui %0 : i1 to i32
    %c0_i32_0 = arith.constant 0 : i32
    %2 = arith.cmpi ne, %1, %c0_i32_0 : i32
    scf.if %2 {
      %cst_10 = arith.constant 0.000000e+00 : f32
      %13 = vector.broadcast %cst_10 : f32 to vector<64x128xf32>
      %c0_11 = arith.constant 0 : index
      %c0_12 = arith.constant 0 : index
      %14 = vector.load %arg5[%c0_11, %c0_12] : memref<64x128xf32, #tpu.memory_space<vmem>>, vector<64x128xf32>
      tpu.vector_store %arg5[%c0_11, %c0_12], %13 {strides = array<i32>} : memref<64x128xf32, #tpu.memory_space<vmem>>, vector<64x128xf32>,
    } else {
    }
    %c0 = arith.constant 0 : index
    %c0_1 = arith.constant 0 : index
    %c0_2 = arith.constant 0 : index
    %3 = vector.load %arg2[%c0, %c0_1, %c0_2] : memref<8x8x128xbf16, #tpu.memory_space<vmem>>, vector<8x8x128xbf16>
    %4 = vector.shape_cast %3 : vector<8x8x128xbf16> to vector<64x128xbf16>
    %c0_3 = arith.constant 0 : index
    %c0_4 = arith.constant 0 : index
    %5 = vector.load %arg5[%c0_3, %c0_4] : memref<64x128xf32, #tpu.memory_space<vmem>>, vector<64x128xf32>
    %c0_5 = arith.constant 0 : index
    %c0_6 = arith.constant 0 : index
    %6 = vector.load %arg3[%c0_5, %c0_6] : memref<128x128xbf16, #tpu.memory_space<vmem>>, vector<128x128xbf16>
    %cst = arith.constant dense<0.000000e+00> : vector<64x128xf32>
    %7 = tpu.matmul %4, %6, %cst {dimension_numbers = #tpu.dot_dimension_numbers<[1], [0], [0], [1], [0, 0, 1, 1], [], []>} : vector<64x128xbf16>, vector<128x128xbf16>, vector<64x128xf32> -> vector<64x128xf32>
    %8 = arith.addf %5, %7 : vector<64x128xf32>
    %c0_7 = arith.constant 0 : index
    %c0_8 = arith.constant 0 : index
    %9 = vector.load %arg5[%c0_7, %c0_8] : memref<64x128xf32, #tpu.memory_space<vmem>>, vector<64x128xf32>
    tpu.vector_store %arg5[%c0_7, %c0_8], %8 {strides = array<i32>} : memref<64x128xf32, #tpu.memory_space<vmem>>, vector<64x128xf32>,
    %c3_i32 = arith.constant 3 : i32
    %10 = arith.cmpi eq, %arg1, %c3_i32 : i32
    %11 = arith.extui %10 : i1 to i32
    %c0_i32_9 = arith.constant 0 : i32
    %12 = arith.cmpi ne, %11, %c0_i32_9 : i32
    scf.if %12 {
      %c0_10 = arith.constant 0 : index
      %c0_11 = arith.constant 0 : index
      %13 = vector.load %arg5[%c0_10, %c0_11] : memref<64x128xf32, #tpu.memory_space<vmem>>, vector<64x128xf32>
      %cst_12 = arith.constant 0.000000e+00 : f32
      %14 = vector.broadcast %cst_12 : f32 to vector<8x32xf32>
      %15 = vector.extract_strided_slice %13 {offsets = [0, 0], sizes = [64, 32], strides = [1, 1]} : vector<64x128xf32> to vector<64x32xf32>
      %16 = vector.shape_cast %15 : vector<64x32xf32> to vector<8x8x32xf32>
      %17 = vector.extract_strided_slice %13 {offsets = [0, 32], sizes = [64, 32], strides = [1, 1]} : vector<64x128xf32> to vector<64x32xf32>
      %18 = vector.shape_cast %17 : vector<64x32xf32> to vector<8x8x32xf32>
      %19 = vector.shape_cast %14 : vector<8x32xf32> to vector<8x1x32xf32>
      %20 = vector.broadcast %19 : vector<8x1x32xf32> to vector<8x8x32xf32>
      %21 = arith.mulf %16, %20 : vector<8x8x32xf32>
      %cst_13 = arith.constant dense<0.000000e+00> : vector<8x8xf32>
      %22 = vector.multi_reduction <add>, %21, %cst_13 [2] : vector<8x8x32xf32> to vector<8x8xf32>
      %cst_14 = arith.constant dense<0xFF800000> : vector<8xf32>
      %23 = vector.multi_reduction <maximumf>, %22, %cst_14 [1] : vector<8x8xf32> to vector<8xf32>
      %24 = vector.shape_cast %23 : vector<8xf32> to vector<8x1xf32>
      %25 = vector.broadcast %24 : vector<8x1xf32> to vector<8x8xf32>
      %26 = arith.subf %22, %25 : vector<8x8xf32>
      %27 = math.exp %26 : vector<8x8xf32>
      %cst_15 = arith.constant dense<0.000000e+00> : vector<8xf32>
      %28 = vector.multi_reduction <add>, %27, %cst_15 [1] : vector<8x8xf32> to vector<8xf32>
      %29 = vector.shape_cast %28 : vector<8xf32> to vector<8x1xf32>
      %30 = tpu.reciprocal %29 {approx = true} : vector<8x1xf32> -> vector<8x1xf32>
      %31 = vector.broadcast %30 : vector<8x1xf32> to vector<8x8xf32>
      %32 = arith.mulf %27, %31 : vector<8x8xf32>
      %33 = vector.shape_cast %32 : vector<8x8xf32> to vector<8x8x1xf32>
      %34 = vector.broadcast %33 : vector<8x8x1xf32> to vector<8x8x32xf32>
      %35 = arith.mulf %18, %34 : vector<8x8x32xf32>
      %cst_16 = arith.constant dense<0.000000e+00> : vector<8x32xf32>
      %36 = vector.multi_reduction <add>, %35, %cst_16 [1] : vector<8x8x32xf32> to vector<8x32xf32>
      %37 = arith.addf %14, %36 : vector<8x32xf32>
      %38 = vector.extract_strided_slice %13 {offsets = [0, 32], sizes = [64, 32], strides = [1, 1]} : vector<64x128xf32> to vector<64x32xf32>
      %39 = vector.shape_cast %38 : vector<64x32xf32> to vector<8x8x32xf32>
      %40 = vector.extract_strided_slice %13 {offsets = [0, 64], sizes = [64, 32], strides = [1, 1]} : vector<64x128xf32> to vector<64x32xf32>
      %41 = vector.shape_cast %40 : vector<64x32xf32> to vector<8x8x32xf32>
      %42 = vector.shape_cast %37 : vector<8x32xf32> to vector<8x1x32xf32>
      %43 = vector.broadcast %42 : vector<8x1x32xf32> to vector<8x8x32xf32>
      %44 = arith.mulf %39, %43 : vector<8x8x32xf32>
      %cst_17 = arith.constant dense<0.000000e+00> : vector<8x8xf32>
      %45 = vector.multi_reduction <add>, %44, %cst_17 [2] : vector<8x8x32xf32> to vector<8x8xf32>
      %cst_18 = arith.constant dense<0xFF800000> : vector<8xf32>
      %46 = vector.multi_reduction <maximumf>, %45, %cst_18 [1] : vector<8x8xf32> to vector<8xf32>
      %47 = vector.shape_cast %46 : vector<8xf32> to vector<8x1xf32>
      %48 = vector.broadcast %47 : vector<8x1xf32> to vector<8x8xf32>
      %49 = arith.subf %45, %48 : vector<8x8xf32>
      %50 = math.exp %49 : vector<8x8xf32>
      %cst_19 = arith.constant dense<0.000000e+00> : vector<8xf32>
      %51 = vector.multi_reduction <add>, %50, %cst_19 [1] : vector<8x8xf32> to vector<8xf32>
      %52 = vector.shape_cast %51 : vector<8xf32> to vector<8x1xf32>
      %53 = tpu.reciprocal %52 {approx = true} : vector<8x1xf32> -> vector<8x1xf32>
      %54 = vector.broadcast %53 : vector<8x1xf32> to vector<8x8xf32>
      %55 = arith.mulf %50, %54 : vector<8x8xf32>
      %56 = vector.shape_cast %55 : vector<8x8xf32> to vector<8x8x1xf32>
      %57 = vector.broadcast %56 : vector<8x8x1xf32> to vector<8x8x32xf32>
      %58 = arith.mulf %41, %57 : vector<8x8x32xf32>
      %cst_20 = arith.constant dense<0.000000e+00> : vector<8x32xf32>
      %59 = vector.multi_reduction <add>, %58, %cst_20 [1] : vector<8x8x32xf32> to vector<8x32xf32>
      %60 = arith.addf %37, %59 : vector<8x32xf32>
      %61 = vector.extract_strided_slice %13 {offsets = [0, 64], sizes = [64, 32], strides = [1, 1]} : vector<64x128xf32> to vector<64x32xf32>
      %62 = vector.shape_cast %61 : vector<64x32xf32> to vector<8x8x32xf32>
      %63 = vector.extract_strided_slice %13 {offsets = [0, 96], sizes = [64, 32], strides = [1, 1]} : vector<64x128xf32> to vector<64x32xf32>
      %64 = vector.shape_cast %63 : vector<64x32xf32> to vector<8x8x32xf32>
      %65 = vector.shape_cast %60 : vector<8x32xf32> to vector<8x1x32xf32>
      %66 = vector.broadcast %65 : vector<8x1x32xf32> to vector<8x8x32xf32>
      %67 = arith.mulf %62, %66 : vector<8x8x32xf32>
      %cst_21 = arith.constant dense<0.000000e+00> : vector<8x8xf32>
      %68 = vector.multi_reduction <add>, %67, %cst_21 [2] : vector<8x8x32xf32> to vector<8x8xf32>
      %cst_22 = arith.constant dense<0xFF800000> : vector<8xf32>
      %69 = vector.multi_reduction <maximumf>, %68, %cst_22 [1] : vector<8x8xf32> to vector<8xf32>
      %70 = vector.shape_cast %69 : vector<8xf32> to vector<8x1xf32>
      %71 = vector.broadcast %70 : vector<8x1xf32> to vector<8x8xf32>
      %72 = arith.subf %68, %71 : vector<8x8xf32>
      %73 = math.exp %72 : vector<8x8xf32>
      %cst_23 = arith.constant dense<0.000000e+00> : vector<8xf32>
      %74 = vector.multi_reduction <add>, %73, %cst_23 [1] : vector<8x8xf32> to vector<8xf32>
      %75 = vector.shape_cast %74 : vector<8xf32> to vector<8x1xf32>
      %76 = tpu.reciprocal %75 {approx = true} : vector<8x1xf32> -> vector<8x1xf32>
      %77 = vector.broadcast %76 : vector<8x1xf32> to vector<8x8xf32>
      %78 = arith.mulf %73, %77 : vector<8x8xf32>
      %79 = vector.shape_cast %78 : vector<8x8xf32> to vector<8x8x1xf32>
      %80 = vector.broadcast %79 : vector<8x8x1xf32> to vector<8x8x32xf32>
      %81 = arith.mulf %64, %80 : vector<8x8x32xf32>
      %cst_24 = arith.constant dense<0.000000e+00> : vector<8x32xf32>
      %82 = vector.multi_reduction <add>, %81, %cst_24 [1] : vector<8x8x32xf32> to vector<8x32xf32>
      %83 = arith.addf %60, %82 : vector<8x32xf32>
      %84 = tpu.concatenate %14, %37, %60, %83 in 1 : vector<8x32xf32>, vector<8x32xf32>, vector<8x32xf32>, vector<8x32xf32> -> vector<8x128xf32>
      %c0_25 = arith.constant 0 : index
      %c0_26 = arith.constant 0 : index
      %85 = vector.load %arg4[%c0_25, %c0_26] : memref<8x128xf32, #tpu.memory_space<vmem>>, vector<8x128xf32>
      tpu.vector_store %arg4[%c0_25, %c0_26], %84 {strides = array<i32>} : memref<8x128xf32, #tpu.memory_space<vmem>>, vector<8x128xf32>,
    } else {
    }
    return
  }
  func.func @transform_0(%arg0: i32, %arg1: i32) -> (i32, i32, i32) {
    %c0_i32 = arith.constant 0 : i32
    %c0_i32_0 = arith.constant 0 : i32
    return %arg0, %c0_i32, %arg1 : i32, i32, i32
  }
  func.func @transform_1(%arg0: i32, %arg1: i32) -> (i32, i32) {
    %c0_i32 = arith.constant 0 : i32
    %c0_i32_0 = arith.constant 0 : i32
    return %arg1, %c0_i32 : i32, i32
  }
  func.func @transform_2(%arg0: i32, %arg1: i32) -> (i32, i32) {
    %c0_i32 = arith.constant 0 : i32
    %c0_i32_0 = arith.constant 0 : i32
    return %arg0, %c0_i32 : i32, i32
  }
}

</mosaic_0001>

<bundles_post_ra>
// kernel: tpu_custom_call.1
= control target key start
LH: loop header
LB: loop body
LE: loop exit
PB: predicated region body
PF: predicated region fallthrough
CT: control target
= control target key end

     0   :  { %s2848_s0 = inlined_call_operand.hbm [shape: bf16[16,8,512], index: 0, kind: input, shape index: {}]   ;;  %s2849_s1 = inlined_call_operand.hbm [shape: bf16[512,128], index: 1, kind: input, shape index: {}]   ;;  %s2850_s2 = inlined_call_operand.hbm [shape: f32[16,128], index: 2, kind: output, shape index: {}]  }
   0x1   :  { %2858 = sst [smem:[#allocation17_spill]] %s2848_s0 }
   0x2   :  { %2859 = sst [smem:[#allocation18_spill]] %s2849_s1 }
   0x3   :  { %2860 = sst [smem:[#allocation19_spill]] %s2850_s2 }
   0x4   :  { %7 = vsyncpa [#allocation4], 0 }
   0x5   :  { %9 = vsyncpa [#allocation4 + $0x1], 0 }
   0x6   :  { %10 = vsyncpa [#allocation7], 0 }
   0x7   :  { %12 = vsyncpa [#allocation7 + $0x1], 0 }
   0x8   :  { %13 = vsyncpa [#allocation5], 0 }
   0x9   :  { %15 = vsyncpa [#allocation5 + $0x1], 0  ;;  %s2186_s9 = smov 0   ;;  %s2188_s10 = smov 0  }
   0xa   :  { %s2190_s11 = smov 0   ;;  %s2192_s12 = smov 0  }
   0xb   :  { %s2194_s13 = smov 0   ;;  %s2196_s14 = smov 0  }
   0xc   :  { %s2198_s15 = smov 0   ;;  %s2200_s16 = smov 0  }
   0xd   :  { %s2202_s17 = smov 0   ;;  %s2204_s18 = smov 0  }
   0xe   :  { %s2206_s19 = smov 0   ;;  %s2208_s20 = smov 0  }
   0xf   :  { %s2210_s21 = smov 0   ;;  %s2212_s22 = smov 0  }
  0x10 LB: > { %2861 = sst [smem:[#allocation12_spill]] %s2145_s18  ;;  %s30_s23 = sadd.s32 1, %s2153_s20  ;;  %s2161_s22 = sphi %s2212_s22, %s21_s22   ;;  %s2157_s21 = sphi %s2210_s21, %s2886_s21   ;;  %s2153_s20 = sphi %s2208_s20, %s2897_s20   ;;  %s2149_s19 = sphi %s2206_s19, %s2884_s19   ;;  %s2145_s18 = sphi %s2204_s18, %s2896_s18   ;;  %s2141_s17 = sphi %s2202_s17, %s2895_s17   ;;  %s2137_s16 = sphi %s2200_s16, %s2894_s16   ;;  %s2133_s15 = sphi %s2198_s15, %s2893_s15   ;;  %s2129_s14 = sphi %s2196_s14, %s2892_s14   ;;  %s2125_s13 = sphi %s2194_s13, %s2891_s13   ;;  %s2121_s12 = sphi %s2192_s12, %s2890_s12   ;;  %s2117_s11 = sphi %s2190_s11, %s2889_s11   ;;  %s2113_s10 = sphi %s2188_s10, %s2888_s10   ;;  %s2109_s9 = sphi %s2186_s9, %s2887_s9  }
  0x11   : > { %2862 = sst [smem:[#allocation13_spill]] %s2149_s19  ;;  %s33_s24 = sadd.s32 1, %s2157_s21 }
  0x12   : > { %2863 = sst [smem:[#allocation14_spill]] %s2157_s21  ;;  %p31_p0 = scmp.ge.s32.totalorder %s30_s23, 4 }
  0x13   : > { %s42_s25 = sadd.s32 1, %s2141_s17  ;;  %p49_p1 = scmp.ne.s32.totalorder %s2141_s17, %s2137_s16 }
  0x14   : > { %p50_p2 = scmp.eq.s32.totalorder %s2161_s22, 0  ;;  %s2899_s23 = smov (%p31_p0, %s30_s23), 0 }
  0x15   : > { %2864 = sst [smem:[#allocation15_spill]] %s2899_s23  ;;  %s2901_s24 = smov (!%p31_p0, %s33_s24), %s2157_s21 }
  0x16   : > { %s2267_s26 = ssub.s32 %s2153_s20, %s2899_s23  ;;  %p2271_p3 = por %p50_p2, %p49_p1 }
  0x17   : > { %p35_p4 = scmp.ge.s32.totalorder %s2901_s24, 2  ;;  %p55_p5 = scmp.ne.s32.totalorder %s2137_s16, %s2133_s15 }
  0x18   : > { %p66_p6 = scmp.eq.s32.totalorder %s2267_s26, 0  ;;  %s94_s28 = sadd.s32 1, %s2117_s11 }
  0x19   : > { %s2903_s24 = smov (%p35_p4, %s2901_s24), 0  ;;  %p2854_p7 = scmp.lt.s32.totalorder %s2161_s22, 8 }
  0x1a   : > { %2866 = sst [smem:[#allocation16_spill]] %s2903_s24  ;;  %s37_s29 = ssub.s32 %s2157_s21, %s2903_s24 }
  0x1b   : > { %s131_s30 = sand.u32 1, %s2141_s17   ;;  %s39_s3 = sor.u32 %s2267_s26, %s37_s29 }
  0x1c   : > { %p92_p8 = scmp.eq.s32.totalorder %s37_s29, 0  ;;  %p40_p9 = scmp.eq.s32.totalorder %s39_s3, 0 }
  0x1d   : > { %s1644_s6 = sshll.u32 %s131_s30, 5  ;;  %s1709_s7 = sshll.u32 %s2157_s21, 5 }
  0x1e   : > { %s2287_s4 = scalar_select %p92_p8, %s2117_s11, %s94_s28  }
  0x1f   : > { %s2290_s5 = scalar_select %p40_p9, %s2141_s17, %s42_s25  }
  0x20   : > { %s140_s8 = sadd.s32 %s2153_s20, %s1709_s7  ;;  %s135_s2 = scalar_lea.vmem [#allocation3], %s1644_s6 }
  0x21   : > { %s1647_s23 = sshll.u32 %s140_s8, 2  ;;  %s145_s24 = sshll.u32 %s135_s2, 4  ;;  %s146_s24 = int_to_ptr.vmem [resolvable:$true] %s145_s24 }
  0x22   : > { %s2867_s0 = sld [smem:[#allocation17_spill]]  ;;  %p1754_p10 = pnand %p2854_p7, %p2271_p3 }
  0x23   : > { %p1651_p11 = scmp.ge.s32.totalorder %s2161_s22, 1  ;;  %s132_s2 = scalar_lea.sflag [#allocation4], %s131_s30 }
  0x24   : > { %s2163_s18 = smov 256   ;;  %s2855_s19 = smov 64  }
  0x25   : > { %p175_p12 = scmp.lt.s32.totalorder %s2161_s22, 9  ;;  %s1640_s25 = sadd.s32 4294967295, %s2161_s22  }
  0x26   : > { %s1641_s27 = sadd.s32 4294967294, %s2161_s22   ;;  %p56_p0 = scmp.eq.s32.totalorder %s1640_s25, 0 }
  0x27   : > { %p2305_p13 = pnand %p1651_p11, %p175_p12  ;;  %s68_s29 = sadd.s32 1, %s2129_s14 }
  0x28   : > { %s142_s1 = scalar_lea.hbm %s2867_s0, %s1647_s23  ;;  %s2856_s23 = smov 4  }
  0x29   : > { %s143_s28 = sshll.u32 %s142_s1, 4  ;;  %p2320_p1 = por %p56_p0, %p55_p5  ;;  %s144_s28 = int_to_ptr.hbm [resolvable:$true] %s143_s28 }
  0x2a   : > { %1756 = dma.hbm_to_vmem [thread:$0]  (!%p1754_p10), %s144_s28, 512, %s146_s24, %s132_s2, %s2163_s18, %s2855_s19, %s2856_s23  }
  0x2b   : > { %s2315_s30 = scalar_select %p66_p6, %s2129_s14, %s68_s29  }
  0x2c   : > { %p75_p3 = scmp.ne.s32.totalorder %s2129_s14, %s2125_s13  ;;  %p81_p4 = scmp.ne.s32.totalorder %s2125_s13, %s2121_s12 }
  0x2d   : > { %p104_p8 = scmp.ne.s32.totalorder %s2117_s11, %s2113_s10  ;;  %p105_p10 = scmp.eq.s32.totalorder %s1640_s25, 7 }
  0x2e   : > { %p2332_p9 = por %p75_p3, %p50_p2  ;;  %p2336_p11 = por %p81_p4, %p56_p0 }
  0x2f   : > { %p110_p6 = scmp.ne.s32.totalorder %s2113_s10, %s2109_s9  ;;  %p2342_p5 = por %p105_p10, %p104_p8 }
  0x30   : > { %p111_p12 = scmp.eq.s32.totalorder %s1641_s27, 7  ;;  %s155_s12 = sand.u32 1, %s2129_s14  }
  0x31   : > { %s1710_s6 = sshll.u32 %s2153_s20, 6  ;;  %s1648_s8 = sshll.u32 %s155_s12, 6 }
  0x32   : > { %p2348_p7 = por %p111_p12, %p110_p6  ;;  %s2874_s18 = sld [smem:[#allocation18_spill]] }
  0x33   : > { %s159_s19 = scalar_lea.vmem [#allocation6], %s1648_s8  ;;  %p2875_p2 = scmp.lt.s32.totalorder %s2161_s22, 8 }
  0x34   : > { %s167_s23 = sshll.u32 %s159_s19, 4  ;;  %s156_s27 = scalar_lea.sflag [#allocation7], %s155_s12  ;;  %s168_s23 = int_to_ptr.vmem [resolvable:$true] %s167_s23 }
  0x35   : > { %p1757_p0 = pnand %p2875_p2, %p2332_p9  ;;  %s2876_s0 = smov 4  }
  0x36   : > { %s2877_s21 = smov 64   ;;  %179 = sbr.rel (%p2305_p13) target bundleno = 3012 (0xbc4), region = 28 }
  0x37   : > { %s181_s28 = sand.u32 (!%p2305_p13), 1, %s2137_s16  }
  0x38   : > { %s164_s25 = scalar_lea.hbm %s2874_s18, %s1710_s6  ;;  %s1652_s6 = sshll.u32 (!%p2305_p13), %s181_s28, 5 }
  0x39   : > { %s165_s29 = sshll.u32 %s164_s25, 4  ;;  %s182_s2 = scalar_lea.sflag (!%p2305_p13), [#allocation4], %s181_s28  ;;  %s166_s29 = int_to_ptr.hbm [resolvable:$true] %s165_s29 }
  0x3a   : > { %1759 = dma.hbm_to_vmem [thread:$0]  (!%p1757_p0), %s166_s29, 1024, %s168_s23, %s156_s27, %s2877_s21, %s2877_s21, %s2876_s0  }
  0x3b   : > { %s2365_s18 = scalar_lea.vmem [#allocation3], %s1652_s6 }
  0x3c   : > { %2096 = dma.done.wait (%p2320_p1), %s182_s2, 512  }
  0x3d   : > { %2098 = vsyncadd (%p2320_p1), %s182_s2, 4294966784  ;;  %s191_s19 = sand.u32 1, %s2125_s13  }
  0x3e   : > { %s1653_s24 = sshll.u32 %s191_s19, 6  ;;  %s192_s0 = scalar_lea.sflag [#allocation7], %s191_s19 }
  0x3f   : > { %s2372_s21 = scalar_lea.vmem [#allocation6], %s1653_s24 }
  0x40   : > { %2100 = dma.done.wait (%p2336_p11), %s192_s0, 1024  }
  0x41   : > { %2102 = vsyncadd (%p2336_p11), %s192_s0, 4294966272  ;;  %s219_s23 = sand.u32 1, %s2113_s10   ;;  %s2878_s12 = sld [smem:[#allocation12_spill]] }
  0x42   : > { %s2381_s1 = sshll.u32 %s219_s23, 3 }
  0x43   : > { %s221_s3 = scalar_lea.vmem [#allocation8], %s2381_s1 }
  0x47   : > { %p1655_p13 = scmp.ne.s32.totalorder %s2878_s12, 0 }
  0x49   : > { %227 = sbr.rel (%p1655_p13) target bundleno = 87 (0x57), region = 40 }
  0x4e   : > { %v2166_v0 = vmov 0.0  }
  0x4f   : > { %228 = vst [vmem:[#allocation2 + $0x30] sm:$0xff] %v2166_v0 }
  0x50   : > { %229 = vst [vmem:[#allocation2] sm:$0xff] %v2166_v0 }
  0x51   : > { %230 = vst [vmem:[#allocation2 + $0x18] sm:$0xff] %v2166_v0 }
  0x52   : > { %231 = vst [vmem:[#allocation2 + $0x10] sm:$0xff] %v2166_v0 }
  0x53   : > { %232 = vst [vmem:[#allocation2 + $0x8] sm:$0xff] %v2166_v0 }
  0x54   : > { %233 = vst [vmem:[#allocation2 + $0x20] sm:$0xff] %v2166_v0 }
  0x55   : > { %234 = vst [vmem:[#allocation2 + $0x28] sm:$0xff] %v2166_v0 }
  0x56   : > { %235 = vst [vmem:[#allocation2 + $0x38] sm:$0xff] %v2166_v0 }
  0x57 PF: > { %v1722_v1 = vld [vmem:[%s2372_s21 + $0x38] sm:$0xff]  ;;  %v1721_v2 = vld [vmem:[%s2372_s21 + $0x30] sm:$0xff]  ;;  %v1720_v3 = vld [vmem:[%s2372_s21 + $0x28] sm:$0xff]  ;;  %s2879_s26 = sld [smem:[#allocation12_spill]] }
  0x58   : > { %340 = vmatpush.bf16.msra.mxu0 %v1722_v1  ;;  %1723 = vmatpush.bf16.msra.mxu1 %v1722_v1  ;;  %v1719_v4 = vld [vmem:[%s2372_s21 + $0x20] sm:$0xff]  ;;  %v1718_v5 = vld [vmem:[%s2372_s21 + $0x18] sm:$0xff]  ;;  %v1717_v6 = vld [vmem:[%s2372_s21 + $0x10] sm:$0xff] }
  0x59   : > { %1724 = vmatpush.bf16.msra.mxu2 %v1722_v1  ;;  %1725 = vmatpush.bf16.msra.mxu3 %v1722_v1  ;;  %v1716_v7 = vld [vmem:[%s2372_s21 + $0x8] sm:$0xff]  ;;  %v1715_v8 = vld [vmem:[%s2372_s21] sm:$0xff]  ;;  %v1713_v11 = vld [vmem:[%s2365_s18 + $0x10] sm:$0xff] }
  0x5a   : > { %v1711_v9 = vld [vmem:[%s2365_s18] sm:$0xff]  ;;  %v1712_v10 = vld [vmem:[%s2365_s18 + $0x8] sm:$0xff]  ;;  %v1714_v12 = vld [vmem:[%s2365_s18 + $0x18] sm:$0xff] }
  0x5b   : > { %v244_v13 = vld [vmem:[#allocation2 + $0x30] sm:$0xff]  ;;  %v246_v14 = vld [vmem:[#allocation2 + $0x18] sm:$0xff]  ;;  %v248_v19 = vld [vmem:[#allocation2 + $0x8] sm:$0xff] }
  0x5c   : > { %341 = vmatpush.bf16.msra.mxu0 %v1721_v2  ;;  %1726 = vmatpush.bf16.msra.mxu1 %v1721_v2  ;;  %v250_v20 = vld [vmem:[#allocation2 + $0x28] sm:$0xff]  ;;  %v245_v21 = vld [vmem:[#allocation2] sm:$0xff]  ;;  %v247_v22 = vld [vmem:[#allocation2 + $0x10] sm:$0xff] }
  0x5d   : > { %1727 = vmatpush.bf16.msra.mxu2 %v1721_v2  ;;  %1728 = vmatpush.bf16.msra.mxu3 %v1721_v2  ;;  %v249_v31 = vld [vmem:[#allocation2 + $0x20] sm:$0xff]  ;;  %v251_v32 = vld [vmem:[#allocation2 + $0x38] sm:$0xff]  ;;  %p1704_p1 = scmp.ne.s32.totalorder %s2879_s26, 3 }
  0x5e   : > { %s2168_s8 = smov (!%p1704_p1), 96   ;;  %s2169_s25 = smov (!%p1704_p1), 32  }
  0x5f   : > { %s2170_s29 = smov (!%p1704_p1), 64  }
  0x60   : > { %342 = vmatpush.bf16.msra.mxu0 %v1720_v3  ;;  %1729 = vmatpush.bf16.msra.mxu1 %v1720_v3 }
  0x61   : > { %1730 = vmatpush.bf16.msra.mxu2 %v1720_v3  ;;  %1731 = vmatpush.bf16.msra.mxu3 %v1720_v3 }
  0x64   : > { %343 = vmatpush.bf16.msra.mxu0 %v1719_v4  ;;  %1732 = vmatpush.bf16.msra.mxu1 %v1719_v4 }
  0x65   : > { %1733 = vmatpush.bf16.msra.mxu2 %v1719_v4  ;;  %1734 = vmatpush.bf16.msra.mxu3 %v1719_v4 }
  0x68   : > { %344 = vmatpush.bf16.msra.mxu0 %v1718_v5  ;;  %1735 = vmatpush.bf16.msra.mxu1 %v1718_v5 }
  0x69   : > { %1736 = vmatpush.bf16.msra.mxu2 %v1718_v5  ;;  %1737 = vmatpush.bf16.msra.mxu3 %v1718_v5 }
  0x6c   : > { %345 = vmatpush.bf16.msra.mxu0 %v1717_v6  ;;  %1738 = vmatpush.bf16.msra.mxu1 %v1717_v6 }
  0x6d   : > { %1739 = vmatpush.bf16.msra.mxu2 %v1717_v6  ;;  %1740 = vmatpush.bf16.msra.mxu3 %v1717_v6 }
  0x70   : > { %346 = vmatpush.bf16.msra.mxu0 %v1716_v7  ;;  %1741 = vmatpush.bf16.msra.mxu1 %v1716_v7 }
  0x71   : > { %1742 = vmatpush.bf16.msra.mxu2 %v1716_v7  ;;  %1743 = vmatpush.bf16.msra.mxu3 %v1716_v7 }
  0x74   : > { %347 = vmatpush.bf16.msra.mxu0 %v1715_v8  ;;  %1744 = vmatpush.bf16.msra.mxu1 %v1715_v8 }
  0x75   : > { %1745 = vmatpush.bf16.msra.mxu2 %v1715_v8  ;;  %1746 = vmatpush.bf16.msra.mxu3 %v1715_v8 }
  0x77   : > { %348 = vmatmul.bf16.vlgmr.msra.gmra.mxu0 %v1711_v9  ;;  %353 = vmatmul.bf16.vlgmr.msra.gmra.mxu1 %v1712_v10 }
  0x78   : > { %358 = vmatmul.bf16.vlgmr.msra.gmra.mxu2 %v1713_v11  ;;  %363 = vmatmul.bf16.vlgmr.msra.gmra.mxu3 %v1714_v12 }
  0xf4   : > { %v349_v15 = vpop.f32.mrf.mxu0  ;;  %v354_v16 = vpop.f32.mrf.mxu1 }
  0xf5   : > { %v369_v17 = vadd.f32 %v349_v15, %v244_v13  ;;  %v371_v18 = vadd.f32 %v354_v16, %v246_v14 }
  0xf7   : > { %377 = vst [vmem:[#allocation2 + $0x30] sm:$0xff] %v369_v17 }
  0xf8   : > { %379 = vst [vmem:[#allocation2 + $0x18] sm:$0xff] %v371_v18 }
  0xfb   : > { %v359_v23 = vpop.f32.mrf.mxu2  ;;  %v364_v24 = vpop.f32.mrf.mxu3 }
  0xfc   : > { %v373_v25 = vadd.f32 %v359_v23, %v248_v19  ;;  %v375_v26 = vadd.f32 %v364_v24, %v250_v20  ;;  %v351_v27 = vpop.f32.mrf.mxu0  ;;  %v356_v28 = vpop.f32.mrf.mxu1 }
  0xfd   : > { %v370_v29 = vadd.f32 %v351_v27, %v245_v21  ;;  %v372_v30 = vadd.f32 %v356_v28, %v247_v22 }
  0xfe   : > { %381 = vst [vmem:[#allocation2 + $0x8] sm:$0xff] %v373_v25 }
  0xff   : > { %383 = vst [vmem:[#allocation2 + $0x28] sm:$0xff] %v375_v26 }
 0x100   : > { %378 = vst [vmem:[#allocation2] sm:$0xff] %v370_v29 }
 0x101   : > { %380 = vst [vmem:[#allocation2 + $0x10] sm:$0xff] %v372_v30 }
 0x103   : > { %v361_v33 = vpop.f32.mrf.mxu2  ;;  %v366_v34 = vpop.f32.mrf.mxu3  ;;  %388 = sbr.rel (%p1704_p1) target bundleno = 2991 (0xbaf), region = 44 }
 0x104   : > { %v374_v35 = vadd.f32 %v361_v33, %v249_v31  ;;  %v376_v36 = vadd.f32 %v366_v34, %v251_v32 }
 0x106   : > { %382 = vst [vmem:[#allocation2 + $0x20] sm:$0xff] %v374_v35 }
 0x107   : > { %384 = vst [vmem:[#allocation2 + $0x38] sm:$0xff] %v376_v36 }
 0x108   : > { %v2398_v37 = vld [vmem:[#allocation2 + $0x30] sm:$0xff]  ;;  %vm405_vm0 = vcmask 261120   ;;  %v2400_v38 = vld [vmem:[#allocation2 + $0x18] sm:$0xff]  ;;  %v2402_v39 = vld [vmem:[#allocation2 + $0x8] sm:$0xff]  ;;  %v438_v63 = vlaneseq  ;;  %vm448_vm1 = vcmask 1041409   ;;  %vm450_vm2 = vcmask 1042434  }
 0x109   : > { %v397_v40 = vmul.f32 0.0, %v2398_v37  ;;  %v399_v41 = vmul.f32 0.0, %v2400_v38  ;;  %v401_v42 = vmul.f32 0.0, %v2402_v39  ;;  %v2407_v43 = vld [vmem:[#allocation2] sm:$0xff]  ;;  %v2409_v44 = vld [vmem:[#allocation2 + $0x10] sm:$0xff]  ;;  %v2422_v55 = vld [vmem:[#allocation2 + $0x28] sm:$0xff] }
 0x10a   : > { %v398_v49 = vmul.f32 0.0, %v2407_v43  ;;  %v400_v50 = vmul.f32 0.0, %v2409_v44  ;;  %v403_v57 = vmul.f32 0.0, %v2422_v55  ;;  %v2430_v1 = vand.u32 127, %v438_v63 }
 0x10b   : > { %v406_v45 = vsel %vm405_vm0, %v397_v40, 0.0  ;;  %v412_v46 = vsel %vm405_vm0, %v399_v41, 0.0  ;;  %v418_v47 = vsel %vm405_vm0, %v401_v42, 0.0  ;;  %vm452_vm3 = vcmask 1043459  }
 0x10c   : > { %407 = vadd.xlane.f32.xlu0 %v406_v45  ;;  %413 = vadd.xlane.f32.xlu1 %v412_v46  ;;  %v409_v52 = vsel %vm405_vm0, %v398_v49, 0.0  ;;  %v415_v53 = vsel %vm405_vm0, %v400_v50, 0.0  ;;  %v424_v59 = vsel %vm405_vm0, %v403_v57, 0.0  ;;  %vm454_vm4 = vcmask 1044484  }
 0x10d   : > { %v2414_v48 = vld [vmem:[#allocation2 + $0x20] sm:$0xff]  ;;  %419 = vadd.xlane.f32.xlu2 %v418_v47  ;;  %vm456_vm5 = vcmask 1045509   ;;  %vm458_vm6 = vcmask 1046534   ;;  %vm460_vm7 = vcmask 1047559   ;;  %vm463_vm8 = vcmask 64512  }
 0x10e   : > { %v402_v51 = vmul.f32 0.0, %v2414_v48  ;;  %v2424_v56 = vld [vmem:[#allocation2 + $0x38] sm:$0xff]  ;;  %v2167_v23 = vmov 0   ;;  %vm633_vm9 = vcmask 523520   ;;  %vm955_vm10 = vcmask 785920  }
 0x10f   : > { %v404_v58 = vmul.f32 0.0, %v2424_v56  ;;  %1888 = vset.pattern.permute.xlu2 %v2167_v23  ;;  %1887 = vset.pattern.permute.xlu1 %v2167_v23  ;;  %vm1349_vm11 = vcmask 1048320   ;;  %vm1513_vm12 = vcmask 523264   ;;  %vm1515_vm13 = vcmask 785408  }
 0x110   : > { %v421_v54 = vsel %vm405_vm0, %v402_v51, 0.0  ;;  %1886 = vset.pattern.permute.xlu0 %v2167_v23 }
 0x111   : > { %v427_v60 = vsel %vm405_vm0, %v404_v58, 0.0 }
 0x114   : > { %410 = vadd.xlane.f32.xlu0 %v409_v52  ;;  %416 = vadd.xlane.f32.xlu1 %v415_v53 }
 0x115   : > { %422 = vadd.xlane.f32.xlu2 %v421_v54 }
 0x11c   : > { %425 = vadd.xlane.f32.xlu0 %v424_v59  ;;  %428 = vadd.xlane.f32.xlu1 %v427_v60 }
 0x17f   : > { %v408_v61 = vpop.xlane.xlu0 %407  ;;  %v414_v62 = vpop.xlane.xlu1 %413 }
 0x180   : > { %v420_v0 = vpop.xlane.xlu2 %419  ;;  %v440_v4 = vperm.slane %v408_v61, %v2430_v1  ;;  %v442_v7 = vperm.slane %v414_v62, %v2430_v1 }
 0x181   : > { %v444_v11 = vperm.slane %v420_v0, %v2430_v1 }
 0x187   : > { %v411_v2 = vpop.xlane.xlu0 %410  ;;  %v417_v3 = vpop.xlane.xlu1 %416 }
 0x188   : > { %v441_v5 = vperm.slane %v411_v2, %v2430_v1  ;;  %v443_v6 = vperm.slane %v417_v3, %v2430_v1  ;;  %v423_v9 = vpop.xlane.xlu2 %422 }
 0x189   : > { %v445_v13 = vperm.slane %v423_v9, %v2430_v1 }
 0x18a   : > { %v449_v8 = vsel %vm448_vm1, %v441_v5, %v440_v4 }
 0x18b   : > { %v451_v10 = vsel %vm450_vm2, %v442_v7, %v449_v8 }
 0x18c   : > { %v453_v12 = vsel %vm452_vm3, %v443_v6, %v451_v10 }
 0x18d   : > { %v455_v14 = vsel %vm454_vm4, %v444_v11, %v453_v12 }
 0x18e   : > { %v457_v19 = vsel %vm456_vm5, %v445_v13, %v455_v14 }
 0x18f   : > { %v426_v15 = vpop.xlane.xlu0 %425  ;;  %v429_v16 = vpop.xlane.xlu1 %428 }
 0x190   : > { %v446_v17 = vperm.slane %v426_v15, %v2430_v1  ;;  %v447_v18 = vperm.slane %v429_v16, %v2430_v1 }
 0x192   : > { %v459_v20 = vsel %vm458_vm6, %v446_v17, %v457_v19 }
 0x193   : > { %v461_v21 = vsel %vm460_vm7, %v447_v18, %v459_v20 }
 0x194   : > { %v464_v22 = vsel %vm463_vm8, %v461_v21, -inf }
 0x195   : > { %465 = vmax.xlane.f32.xlu2 %v464_v22 }
 0x208   : > { %v466_v24 = vpop.xlane.xlu2 %465 }
 0x209   : > { %v470_v25 = vperm.slane %v466_v24, 2  ;;  %v469_v26 = vperm.slane %v466_v24, 1  ;;  %v468_v27 = vperm.slane %v466_v24, 0  ;;  %v471_v31 = vperm.slane %v466_v24, 3 }
 0x20a   : > { %v472_v32 = vperm.slane %v466_v24, 4  ;;  %v475_v33 = vperm.slane %v466_v24, 7  ;;  %v473_v46 = vperm.slane %v466_v24, 5  ;;  %v474_v49 = vperm.slane %v466_v24, 6 }
 0x20b   : > { %v486_v28 = vsub.f32 %v414_v62, %v470_v25  ;;  %v485_v29 = vsub.f32 %v411_v2, %v469_v26  ;;  %v484_v30 = vsub.f32 %v408_v61, %v468_v27  ;;  %v487_v40 = vsub.f32 %v417_v3, %v471_v31 }
 0x20c   : > { %v488_v41 = vsub.f32 %v420_v0, %v472_v32  ;;  %v491_v42 = vsub.f32 %v429_v16, %v475_v33  ;;  %v489_v54 = vsub.f32 %v423_v9, %v473_v46  ;;  %v490_v57 = vsub.f32 %v426_v15, %v474_v49 }
 0x20d   : > { %v496_v34 = vmul.f32 1.442695, %v486_v28  ;;  %v494_v35 = vmul.f32 1.442695, %v485_v29  ;;  %v492_v36 = vmul.f32 1.442695, %v484_v30 }
 0x20e   : > { %v498_v45 = vmul.f32 1.442695, %v487_v40  ;;  %v500_v47 = vmul.f32 1.442695, %v488_v41  ;;  %v506_v51 = vmul.f32 1.442695, %v491_v42 }
 0x20f   : > { %1889 = vpow2.f32 %v496_v34  ;;  %v502_v58 = vmul.f32 1.442695, %v489_v54  ;;  %v504_v59 = vmul.f32 1.442695, %v490_v57 }
 0x210   : > { %1891 = vpow2.f32 %v494_v35 }
 0x211   : > { %1893 = vpow2.f32 %v492_v36 }
 0x212   : > { %1895 = vpow2.f32 %v498_v45 }
 0x213   : > { %1897 = vpow2.f32 %v500_v47 }
 0x214   : > { %1899 = vpow2.f32 %v506_v51 }
 0x215   : > { %v2448_v50 = vpop.eup %1889  ;;  %1901 = vpow2.f32 %v502_v58 }
 0x216   : > { %v1892_v52 = vpop.eup %1891  ;;  %523 = vperm.xlu2 %1888, %v2448_v50   ;;  %1903 = vpow2.f32 %v504_v59 }
 0x217   : > { %v1894_v53 = vpop.eup %1893  ;;  %520 = vperm.xlu1 %1887, %v1892_v52  }
 0x218   : > { %517 = vperm.xlu0 %1886, %v1894_v53   ;;  %v1896_v60 = vpop.eup %1895 }
 0x219   : > { %v1898_v61 = vpop.eup %1897 }
 0x21a   : > { %v1900_v62 = vpop.eup %1899 }
 0x21b   : > { %v1902_v63 = vpop.eup %1901 }
 0x21c   : > { %v1904_v0 = vpop.eup %1903 }
 0x21e   : > { %526 = vperm.xlu2 %1888, %v1896_v60  }
 0x21f   : > { %529 = vperm.xlu1 %1887, %v1898_v61  }
 0x220   : > { %538 = vperm.xlu0 %1886, %v1900_v62  }
 0x226   : > { %532 = vperm.xlu2 %1888, %v1902_v63  }
 0x227   : > { %535 = vperm.xlu1 %1887, %v1904_v0  }
 0x270   : > { %v524_v2 = vpop.permute.xlu2 %523 }
 0x271   : > { %v542_v10 = vperm.slane %v524_v2, %v2430_v1 }
 0x278   : > { %v527_v5 = vpop.permute.xlu2 %526 }
 0x279   : > { %v543_v13 = vperm.slane %v527_v5, %v2430_v1 }
 0x280   : > { %v533_v14 = vpop.permute.xlu2 %532 }
 0x281   : > { %v545_v18 = vperm.slane %v533_v14, %v2430_v1 }
 0x289   : > { %v521_v3 = vpop.permute.xlu1 %520 }
 0x28a   : > { %v518_v4 = vpop.permute.xlu0 %517  ;;  %v541_v6 = vperm.slane %v521_v3, %v2430_v1 }
 0x28b   : > { %v540_v7 = vperm.slane %v518_v4, %v2430_v1 }
 0x28d   : > { %v548_v8 = vsel %vm448_vm1, %v541_v6, %v540_v7 }
 0x28e   : > { %v549_v11 = vsel %vm450_vm2, %v542_v10, %v548_v8 }
 0x28f   : > { %v550_v15 = vsel %vm452_vm3, %v543_v13, %v549_v11 }
 0x291   : > { %v530_v9 = vpop.permute.xlu1 %529 }
 0x292   : > { %v544_v12 = vperm.slane %v530_v9, %v2430_v1  ;;  %v539_v17 = vpop.permute.xlu0 %538 }
 0x293   : > { %v547_v21 = vperm.slane %v539_v17, %v2430_v1 }
 0x294   : > { %v551_v16 = vsel %vm454_vm4, %v544_v12, %v550_v15 }
 0x295   : > { %v552_v22 = vsel %vm456_vm5, %v545_v18, %v551_v16 }
 0x299   : > { %v536_v19 = vpop.permute.xlu1 %535 }
 0x29a   : > { %v546_v20 = vperm.slane %v536_v19, %v2430_v1 }
 0x29c   : > { %v553_v23 = vsel %vm458_vm6, %v546_v20, %v552_v22 }
 0x29d   : > { %v554_v24 = vsel %vm460_vm7, %v547_v21, %v553_v23 }
 0x29e   : > { %v556_v25 = vsel %vm463_vm8, %v554_v24, 0.0 }
 0x29f   : > { %557 = vadd.xlane.f32.xlu2 %v556_v25 }
 0x312   : > { %v558_v26 = vpop.xlane.xlu2 %557 }
 0x313   : > { %1905 = vrcp.f32 %v558_v26 }
 0x319   : > { %v1906_v27 = vpop.eup %1905 }
 0x31a   : > { %v562_v28 = vperm.slane %v1906_v27, 1  ;;  %v561_v29 = vperm.slane %v1906_v27, 0  ;;  %v564_v32 = vperm.slane %v1906_v27, 3  ;;  %v563_v33 = vperm.slane %v1906_v27, 2 }
 0x31b   : > { %v566_v36 = vperm.slane %v1906_v27, 5  ;;  %v565_v40 = vperm.slane %v1906_v27, 4  ;;  %v568_v45 = vperm.slane %v1906_v27, 7  ;;  %v567_v46 = vperm.slane %v1906_v27, 6 }
 0x31c   : > { %v578_v30 = vmul.f32 %v1892_v52, %v562_v28  ;;  %v577_v31 = vmul.f32 %v1894_v53, %v561_v29  ;;  %v580_v34 = vmul.f32 %v1896_v60, %v564_v32  ;;  %v579_v35 = vmul.f32 %v2448_v50, %v563_v33 }
 0x31d   : > { %v582_v41 = vmul.f32 %v1902_v63, %v566_v36  ;;  %v581_v42 = vmul.f32 %v1898_v61, %v565_v40  ;;  %v584_v47 = vmul.f32 %v1900_v62, %v568_v45  ;;  %v583_v49 = vmul.f32 %v1904_v0, %v567_v46 }
 0x31e   : > { %592 = vperm.xlu0 %1886, %v578_v30   ;;  %587 = vperm.xlu1 %1887, %v577_v31  }
 0x326   : > { %602 = vperm.xlu0 %1886, %v580_v34   ;;  %597 = vperm.xlu1 %1887, %v579_v35  }
 0x32e   : > { %612 = vperm.xlu0 %1886, %v582_v41   ;;  %607 = vperm.xlu1 %1887, %v581_v42  }
 0x336   : > { %622 = vperm.xlu0 %1886, %v584_v47   ;;  %617 = vperm.xlu1 %1887, %v583_v49  }
 0x390   : > { %v593_v51 = vpop.permute.xlu0 %592  ;;  %v588_v52 = vpop.permute.xlu1 %587 }
 0x391   : > { %v626_v53 = vmul.f32 %v593_v51, %v2407_v43  ;;  %v625_v50 = vmul.f32 %v588_v52, %v2398_v37 }
 0x393   : > { %v641_v54 = vsel %vm633_vm9, %v626_v53, 0.0  ;;  %v634_v57 = vsel %vm633_vm9, %v625_v50, 0.0 }
 0x394   : > { %v642_v58 = vrot.slane %v641_v54, 4  ;;  %v635_v59 = vrot.slane %v634_v57, 4 }
 0x396   : > { %v643_v60 = vadd.f32 %v642_v58, %v641_v54  ;;  %v636_v61 = vadd.f32 %v635_v59, %v634_v57 }
 0x398   : > { %v644_v63 = vrot.slane %v643_v60, 2  ;;  %v637_v62 = vrot.slane %v636_v61, 2  ;;  %v603_v0 = vpop.permute.xlu0 %602  ;;  %v598_v2 = vpop.permute.xlu1 %597 }
 0x399   : > { %v628_v3 = vmul.f32 %v603_v0, %v2409_v44  ;;  %v627_v4 = vmul.f32 %v598_v2, %v2400_v38 }
 0x39a   : > { %v645_v5 = vadd.f32 %v644_v63, %v643_v60  ;;  %v638_v6 = vadd.f32 %v637_v62, %v636_v61 }
 0x39b   : > { %v655_v7 = vsel %vm633_vm9, %v628_v3, 0.0  ;;  %v648_v8 = vsel %vm633_vm9, %v627_v4, 0.0 }
 0x39c   : > { %v646_v9 = vrot.slane %v645_v5, 1  ;;  %v639_v10 = vrot.slane %v638_v6, 1  ;;  %v656_v11 = vrot.slane %v655_v7, 4  ;;  %v649_v12 = vrot.slane %v648_v8, 4 }
 0x39e   : > { %v2476_v13 = vadd.f32 %v646_v9, %v645_v5  ;;  %v2478_v14 = vadd.f32 %v639_v10, %v638_v6  ;;  %v657_v15 = vadd.f32 %v656_v11, %v655_v7  ;;  %v650_v16 = vadd.f32 %v649_v12, %v648_v8 }
 0x3a0   : > { %v658_v17 = vrot.slane %v657_v15, 2  ;;  %v651_v18 = vrot.slane %v650_v16, 2  ;;  %v613_v19 = vpop.permute.xlu0 %612  ;;  %v608_v20 = vpop.permute.xlu1 %607  ;;  %v699_v21 = vmul.f32 %v2476_v13, %v2407_v43  ;;  %v698_v24 = vmul.f32 %v2478_v14, %v2398_v37 }
 0x3a1   : > { %v630_v22 = vmul.f32 %v613_v19, %v2414_v48  ;;  %v629_v23 = vmul.f32 %v608_v20, %v2402_v39 }
 0x3a2   : > { %v659_v25 = vadd.f32 %v658_v17, %v657_v15  ;;  %v652_v26 = vadd.f32 %v651_v18, %v650_v16  ;;  %716 = vrot.lane.b32.xlu0 %v699_v21, %s2168_s8  ;;  %714 = vrot.lane.b32.xlu1 %v698_v24, %s2168_s8 }
 0x3a3   : > { %v669_v27 = vsel %vm633_vm9, %v630_v22, 0.0  ;;  %v662_v28 = vsel %vm633_vm9, %v629_v23, 0.0 }
 0x3a4   : > { %v660_v29 = vrot.slane %v659_v25, 1  ;;  %v653_v30 = vrot.slane %v652_v26, 1  ;;  %v670_v31 = vrot.slane %v669_v27, 4  ;;  %v663_v32 = vrot.slane %v662_v28, 4 }
 0x3a6   : > { %v2490_v33 = vadd.f32 %v660_v29, %v659_v25  ;;  %v2492_v34 = vadd.f32 %v653_v30, %v652_v26  ;;  %v671_v35 = vadd.f32 %v670_v31, %v669_v27  ;;  %v664_v36 = vadd.f32 %v663_v32, %v662_v28 }
 0x3a8   : > { %v672_v40 = vrot.slane %v671_v35, 2  ;;  %v665_v41 = vrot.slane %v664_v36, 2  ;;  %v623_v42 = vpop.permute.xlu0 %622  ;;  %v618_v45 = vpop.permute.xlu1 %617  ;;  %v701_v46 = vmul.f32 %v2490_v33, %v2409_v44  ;;  %v700_v51 = vmul.f32 %v2492_v34, %v2400_v38 }
 0x3a9   : > { %v632_v47 = vmul.f32 %v623_v42, %v2424_v56  ;;  %v631_v49 = vmul.f32 %v618_v45, %v2422_v55 }
 0x3aa   : > { %v673_v52 = vadd.f32 %v672_v40, %v671_v35  ;;  %v666_v53 = vadd.f32 %v665_v41, %v664_v36  ;;  %720 = vrot.lane.b32.xlu2 %v701_v46, %s2168_s8  ;;  %718 = vrot.lane.b32.xlu1 %v700_v51, %s2168_s8 }
 0x3ab   : > { %v683_v50 = vsel %vm633_vm9, %v632_v47, 0.0  ;;  %v676_v54 = vsel %vm633_vm9, %v631_v49, 0.0 }
 0x3ac   : > { %v674_v57 = vrot.slane %v673_v52, 1  ;;  %v667_v58 = vrot.slane %v666_v53, 1  ;;  %v684_v59 = vrot.slane %v683_v50, 4  ;;  %v677_v60 = vrot.slane %v676_v54, 4 }
 0x3ae   : > { %v2504_v61 = vadd.f32 %v674_v57, %v673_v52  ;;  %v2506_v63 = vadd.f32 %v667_v58, %v666_v53  ;;  %v685_v62 = vadd.f32 %v684_v59, %v683_v50  ;;  %v678_v0 = vadd.f32 %v677_v60, %v676_v54 }
 0x3b0   : > { %v686_v2 = vrot.slane %v685_v62, 2  ;;  %v679_v3 = vrot.slane %v678_v0, 2  ;;  %v703_v4 = vmul.f32 %v2504_v61, %v2414_v48  ;;  %v702_v5 = vmul.f32 %v2506_v63, %v2402_v39 }
 0x3b2   : > { %v687_v6 = vadd.f32 %v686_v2, %v685_v62  ;;  %v680_v7 = vadd.f32 %v679_v3, %v678_v0  ;;  %722 = vrot.lane.b32.xlu0 %v702_v5, %s2168_s8  ;;  %724 = vrot.lane.b32.xlu1 %v703_v4, %s2168_s8 }
 0x3b4   : > { %v688_v8 = vrot.slane %v687_v6, 1  ;;  %v681_v9 = vrot.slane %v680_v7, 1 }
 0x3b6   : > { %v2514_v10 = vadd.f32 %v688_v8, %v687_v6  ;;  %v2516_v11 = vadd.f32 %v681_v9, %v680_v7 }
 0x3b8   : > { %v705_v12 = vmul.f32 %v2514_v10, %v2424_v56  ;;  %v704_v15 = vmul.f32 %v2516_v11, %v2422_v55 }
 0x3ba   : > { %726 = vrot.lane.b32.xlu0 %v704_v15, %s2168_s8  ;;  %728 = vrot.lane.b32.xlu1 %v705_v12, %s2168_s8 }
 0x404   : > { %v721_v20 = vpop.permute.xlu2 %720 }
 0x405   : > { %v747_v22 = vsel %vm405_vm0, %v721_v20, 0.0 }
 0x414   : > { %v717_v16 = vpop.permute.xlu0 %716  ;;  %v715_v17 = vpop.permute.xlu1 %714 }
 0x415   : > { %v741_v18 = vsel %vm405_vm0, %v717_v16, 0.0  ;;  %v738_v19 = vsel %vm405_vm0, %v715_v17, 0.0 }
 0x416   : > { %742 = vadd.xlane.f32.xlu1 %v741_v18  ;;  %739 = vadd.xlane.f32.xlu0 %v738_v19 }
 0x41c   : > { %v719_v21 = vpop.permute.xlu1 %718 }
 0x41d   : > { %v744_v23 = vsel %vm405_vm0, %v719_v21, 0.0 }
 0x41e   : > { %748 = vadd.xlane.f32.xlu0 %v747_v22  ;;  %745 = vadd.xlane.f32.xlu2 %v744_v23 }
 0x424   : > { %v723_v24 = vpop.permute.xlu0 %722  ;;  %v725_v25 = vpop.permute.xlu1 %724 }
 0x425   : > { %v750_v26 = vsel %vm405_vm0, %v723_v24, 0.0  ;;  %v753_v27 = vsel %vm405_vm0, %v725_v25, 0.0 }
 0x426   : > { %751 = vadd.xlane.f32.xlu2 %v750_v26  ;;  %754 = vadd.xlane.f32.xlu1 %v753_v27 }
 0x42c   : > { %v727_v28 = vpop.permute.xlu0 %726  ;;  %v729_v29 = vpop.permute.xlu1 %728 }
 0x42d   : > { %v756_v30 = vsel %vm405_vm0, %v727_v28, 0.0  ;;  %v759_v31 = vsel %vm405_vm0, %v729_v29, 0.0 }
 0x42e   : > { %757 = vadd.xlane.f32.xlu0 %v756_v30  ;;  %760 = vadd.xlane.f32.xlu2 %v759_v31 }
 0x489   : > { %v740_v32 = vpop.xlane.xlu0 %739  ;;  %v743_v36 = vpop.xlane.xlu1 %742 }
 0x48a   : > { %v770_v40 = vperm.slane %v740_v32, %v2430_v1  ;;  %v771_v41 = vperm.slane %v743_v36, %v2430_v1 }
 0x48c   : > { %v778_v47 = vsel %vm448_vm1, %v771_v41, %v770_v40 }
 0x491   : > { %v746_v35 = vpop.xlane.xlu2 %745  ;;  %v749_v42 = vpop.xlane.xlu0 %748 }
 0x492   : > { %v772_v45 = vperm.slane %v746_v35, %v2430_v1  ;;  %v773_v49 = vperm.slane %v749_v42, %v2430_v1 }
 0x494   : > { %v779_v51 = vsel %vm450_vm2, %v772_v45, %v778_v47 }
 0x495   : > { %v780_v50 = vsel %vm452_vm3, %v773_v49, %v779_v51 }
 0x499   : > { %v752_v46 = vpop.xlane.xlu2 %751  ;;  %v755_v53 = vpop.xlane.xlu1 %754 }
 0x49a   : > { %v774_v52 = vperm.slane %v752_v46, %v2430_v1  ;;  %v775_v54 = vperm.slane %v755_v53, %v2430_v1 }
 0x49c   : > { %v781_v57 = vsel %vm454_vm4, %v774_v52, %v780_v50 }
 0x49d   : > { %v782_v0 = vsel %vm456_vm5, %v775_v54, %v781_v57 }
 0x4a1   : > { %v758_v58 = vpop.xlane.xlu0 %757  ;;  %v761_v60 = vpop.xlane.xlu2 %760 }
 0x4a2   : > { %v776_v59 = vperm.slane %v758_v58, %v2430_v1  ;;  %v777_v62 = vperm.slane %v761_v60, %v2430_v1 }
 0x4a4   : > { %v783_v2 = vsel %vm458_vm6, %v776_v59, %v782_v0 }
 0x4a5   : > { %v784_v3 = vsel %vm460_vm7, %v777_v62, %v783_v2 }
 0x4a6   : > { %v786_v4 = vsel %vm463_vm8, %v784_v3, -inf }
 0x4a7   : > { %787 = vmax.xlane.f32.xlu1 %v786_v4 }
 0x51a   : > { %v788_v5 = vpop.xlane.xlu1 %787 }
 0x51b   : > { %v792_v6 = vperm.slane %v788_v5, 2  ;;  %v791_v7 = vperm.slane %v788_v5, 1  ;;  %v790_v8 = vperm.slane %v788_v5, 0  ;;  %v795_v16 = vperm.slane %v788_v5, 5 }
 0x51c   : > { %v794_v17 = vperm.slane %v788_v5, 4  ;;  %v793_v18 = vperm.slane %v788_v5, 3  ;;  %v797_v27 = vperm.slane %v788_v5, 7  ;;  %v796_v30 = vperm.slane %v788_v5, 6 }
 0x51d   : > { %v808_v9 = vsub.f32 %v746_v35, %v792_v6  ;;  %v807_v12 = vsub.f32 %v743_v36, %v791_v7  ;;  %v806_v15 = vsub.f32 %v740_v32, %v790_v8  ;;  %v811_v22 = vsub.f32 %v755_v53, %v795_v16 }
 0x51e   : > { %v810_v23 = vsub.f32 %v752_v46, %v794_v17  ;;  %v809_v24 = vsub.f32 %v749_v42, %v793_v18  ;;  %v813_v35 = vsub.f32 %v761_v60, %v797_v27  ;;  %v812_v36 = vsub.f32 %v758_v58, %v796_v30 }
 0x51f   : > { %v818_v19 = vmul.f32 1.442695, %v808_v9  ;;  %v816_v20 = vmul.f32 1.442695, %v807_v12  ;;  %v814_v21 = vmul.f32 1.442695, %v806_v15 }
 0x520   : > { %v824_v25 = vmul.f32 1.442695, %v811_v22  ;;  %v822_v26 = vmul.f32 1.442695, %v810_v23  ;;  %v820_v29 = vmul.f32 1.442695, %v809_v24 }
 0x521   : > { %1907 = vpow2.f32 %v818_v19  ;;  %v828_v40 = vmul.f32 1.442695, %v813_v35  ;;  %v826_v42 = vmul.f32 1.442695, %v812_v36 }
 0x522   : > { %1909 = vpow2.f32 %v816_v20 }
 0x523   : > { %1911 = vpow2.f32 %v814_v21 }
 0x524   : > { %1913 = vpow2.f32 %v824_v25 }
 0x525   : > { %1915 = vpow2.f32 %v822_v26 }
 0x526   : > { %1917 = vpow2.f32 %v820_v29 }
 0x527   : > { %v2548_v28 = vpop.eup %1907  ;;  %1919 = vpow2.f32 %v828_v40 }
 0x528   : > { %v1910_v31 = vpop.eup %1909  ;;  %845 = vperm.xlu1 %1887, %v2548_v28   ;;  %1921 = vpow2.f32 %v826_v42 }
 0x529   : > { %v1912_v32 = vpop.eup %1911  ;;  %842 = vperm.xlu2 %1888, %v1910_v31  }
 0x52a   : > { %839 = vperm.xlu0 %1886, %v1912_v32   ;;  %v1914_v41 = vpop.eup %1913 }
 0x52b   : > { %v1916_v45 = vpop.eup %1915 }
 0x52c   : > { %v1918_v46 = vpop.eup %1917 }
 0x52d   : > { %v1920_v47 = vpop.eup %1919 }
 0x52e   : > { %v1922_v49 = vpop.eup %1921 }
 0x530   : > { %854 = vperm.xlu1 %1887, %v1914_v41  }
 0x531   : > { %851 = vperm.xlu2 %1888, %v1916_v45  }
 0x532   : > { %848 = vperm.xlu0 %1886, %v1918_v46  }
 0x539   : > { %860 = vperm.xlu2 %1888, %v1920_v47  }
 0x53a   : > { %857 = vperm.xlu0 %1886, %v1922_v49  }
 0x583   : > { %v843_v51 = vpop.permute.xlu2 %842 }
 0x584   : > { %v863_v57 = vperm.slane %v843_v51, %v2430_v1 }
 0x58b   : > { %v852_v54 = vpop.permute.xlu2 %851 }
 0x58c   : > { %v866_v3 = vperm.slane %v852_v54, %v2430_v1 }
 0x593   : > { %v861_v5 = vpop.permute.xlu2 %860 }
 0x594   : > { %v869_v12 = vperm.slane %v861_v5, %v2430_v1 }
 0x59a   : > { %v846_v53 = vpop.permute.xlu1 %845 }
 0x59b   : > { %v864_v58 = vperm.slane %v846_v53, %v2430_v1 }
 0x59c   : > { %v840_v52 = vpop.permute.xlu0 %839 }
 0x59d   : > { %v862_v50 = vperm.slane %v840_v52, %v2430_v1 }
 0x59f   : > { %v870_v59 = vsel %vm448_vm1, %v863_v57, %v862_v50 }
 0x5a0   : > { %v871_v0 = vsel %vm450_vm2, %v864_v58, %v870_v59 }
 0x5a2   : > { %v855_v4 = vpop.permute.xlu1 %854 }
 0x5a3   : > { %v867_v7 = vperm.slane %v855_v4, %v2430_v1 }
 0x5a4   : > { %v849_v60 = vpop.permute.xlu0 %848 }
 0x5a5   : > { %v865_v62 = vperm.slane %v849_v60, %v2430_v1 }
 0x5a7   : > { %v872_v2 = vsel %vm452_vm3, %v865_v62, %v871_v0 }
 0x5a8   : > { %v873_v6 = vsel %vm454_vm4, %v866_v3, %v872_v2 }
 0x5a9   : > { %v874_v15 = vsel %vm456_vm5, %v867_v7, %v873_v6 }
 0x5ac   : > { %v858_v8 = vpop.permute.xlu0 %857 }
 0x5ad   : > { %v868_v9 = vperm.slane %v858_v8, %v2430_v1 }
 0x5af   : > { %v875_v16 = vsel %vm458_vm6, %v868_v9, %v874_v15 }
 0x5b0   : > { %v876_v17 = vsel %vm460_vm7, %v869_v12, %v875_v16 }
 0x5b1   : > { %v878_v18 = vsel %vm463_vm8, %v876_v17, 0.0 }
 0x5b2   : > { %879 = vadd.xlane.f32.xlu1 %v878_v18 }
 0x625   : > { %v880_v19 = vpop.xlane.xlu1 %879 }
 0x626   : > { %1923 = vrcp.f32 %v880_v19 }
 0x62c   : > { %v1924_v20 = vpop.eup %1923 }
 0x62d   : > { %v884_v21 = vperm.slane %v1924_v20, 1  ;;  %v883_v22 = vperm.slane %v1924_v20, 0  ;;  %v886_v25 = vperm.slane %v1924_v20, 3  ;;  %v885_v26 = vperm.slane %v1924_v20, 2 }
 0x62e   : > { %v888_v30 = vperm.slane %v1924_v20, 5  ;;  %v887_v35 = vperm.slane %v1924_v20, 4  ;;  %v890_v42 = vperm.slane %v1924_v20, 7  ;;  %v889_v51 = vperm.slane %v1924_v20, 6 }
 0x62f   : > { %v900_v23 = vmul.f32 %v1910_v31, %v884_v21  ;;  %v899_v24 = vmul.f32 %v1912_v32, %v883_v22  ;;  %v902_v27 = vmul.f32 %v1918_v46, %v886_v25  ;;  %v901_v29 = vmul.f32 %v2548_v28, %v885_v26 }
 0x630   : > { %v904_v36 = vmul.f32 %v1914_v41, %v888_v30  ;;  %v903_v40 = vmul.f32 %v1916_v45, %v887_v35  ;;  %v906_v52 = vmul.f32 %v1920_v47, %v890_v42  ;;  %v905_v31 = vmul.f32 %v1922_v49, %v889_v51 }
 0x631   : > { %914 = vperm.xlu2 %1888, %v900_v23   ;;  %909 = vperm.xlu0 %1886, %v899_v24  }
 0x639   : > { %924 = vperm.xlu2 %1888, %v902_v27   ;;  %919 = vperm.xlu0 %1886, %v901_v29  }
 0x641   : > { %934 = vperm.xlu2 %1888, %v904_v36   ;;  %929 = vperm.xlu0 %1886, %v903_v40  }
 0x649   : > { %944 = vperm.xlu2 %1888, %v906_v52   ;;  %939 = vperm.xlu0 %1886, %v905_v31  }
 0x68b   : > { %v915_v32 = vpop.permute.xlu2 %914 }
 0x68c   : > { %v948_v46 = vmul.f32 %v915_v32, %v2407_v43 }
 0x68e   : > { %v963_v28 = vsel %vm955_vm10, %v948_v46, 0.0 }
 0x68f   : > { %v964_v53 = vrot.slane %v963_v28, 4 }
 0x691   : > { %v965_v50 = vadd.f32 %v964_v53, %v963_v28 }
 0x693   : > { %v966_v54 = vrot.slane %v965_v50, 2  ;;  %v925_v57 = vpop.permute.xlu2 %924 }
 0x694   : > { %v950_v41 = vmul.f32 %v925_v57, %v2409_v44 }
 0x695   : > { %v967_v45 = vadd.f32 %v966_v54, %v965_v50 }
 0x696   : > { %v977_v58 = vsel %vm955_vm10, %v950_v41, 0.0 }
 0x697   : > { %v978_v59 = vrot.slane %v977_v58, 4  ;;  %v968_v47 = vrot.slane %v967_v45, 1 }
 0x699   : > { %v979_v49 = vadd.f32 %v978_v59, %v977_v58  ;;  %v969_v60 = vadd.f32 %v968_v47, %v967_v45 }
 0x69b   : > { %v980_v62 = vrot.slane %v979_v49, 2  ;;  %1022 = vrot.lane.b32.xlu2 %v969_v60, %s2168_s8  ;;  %v935_v2 = vpop.permute.xlu2 %934 }
 0x69c   : > { %v952_v44 = vmul.f32 %v935_v2, %v2414_v48 }
 0x69d   : > { %v981_v0 = vadd.f32 %v980_v62, %v979_v49 }
 0x69e   : > { %v991_v9 = vsel %vm955_vm10, %v952_v44, 0.0 }
 0x69f   : > { %v982_v43 = vrot.slane %v981_v0, 1  ;;  %v992_v18 = vrot.slane %v991_v9, 4 }
 0x6a1   : > { %v983_v3 = vadd.f32 %v982_v43, %v981_v0  ;;  %v993_v48 = vadd.f32 %v992_v18, %v991_v9 }
 0x6a3   : > { %1026 = vrot.lane.b32.xlu1 %v983_v3, %s2168_s8  ;;  %v910_v4 = vpop.permute.xlu0 %909  ;;  %v945_v12 = vpop.permute.xlu2 %944 }
 0x6a4   : > { %v947_v5 = vmul.f32 %v910_v4, %v2398_v37  ;;  %v954_v20 = vmul.f32 %v945_v12, %v2424_v56 }
 0x6a6   : > { %v956_v6 = vsel %vm955_vm10, %v947_v5, 0.0  ;;  %v1005_v25 = vsel %vm955_vm10, %v954_v20, 0.0 }
 0x6a7   : > { %v957_v7 = vrot.slane %v956_v6, 4  ;;  %v1006_v30 = vrot.slane %v1005_v25, 4 }
 0x6a9   : > { %v958_v8 = vadd.f32 %v957_v7, %v956_v6  ;;  %v1007_v51 = vadd.f32 %v1006_v30, %v1005_v25 }
 0x6ab   : > { %v959_v15 = vrot.slane %v958_v8, 2  ;;  %v920_v16 = vpop.permute.xlu0 %919  ;;  %v1008_v53 = vrot.slane %v1007_v51, 2 }
 0x6ac   : > { %v949_v17 = vmul.f32 %v920_v16, %v2400_v38  ;;  %v994_v38 = vrot.slane %v993_v48, 2 }
 0x6ad   : > { %v960_v19 = vadd.f32 %v959_v15, %v958_v8  ;;  %v1009_v45 = vadd.f32 %v1008_v53, %v1007_v51 }
 0x6ae   : > { %v970_v21 = vsel %vm955_vm10, %v949_v17, 0.0  ;;  %v995_v42 = vadd.f32 %v994_v38, %v993_v48 }
 0x6af   : > { %v971_v37 = vrot.slane %v970_v21, 4  ;;  %v961_v22 = vrot.slane %v960_v19, 1  ;;  %v1010_v62 = vrot.slane %v1009_v45, 1 }
 0x6b1   : > { %v972_v23 = vadd.f32 %v971_v37, %v970_v21  ;;  %v962_v24 = vadd.f32 %v961_v22, %v960_v19 }
 0x6b3   : > { %v973_v26 = vrot.slane %v972_v23, 2  ;;  %1020 = vrot.lane.b32.xlu0 %v962_v24, %s2168_s8  ;;  %v930_v27 = vpop.permute.xlu0 %929 }
 0x6b4   : > { %v951_v29 = vmul.f32 %v930_v27, %v2402_v39  ;;  %v996_v39 = vrot.slane %v995_v42, 1 }
 0x6b5   : > { %v974_v35 = vadd.f32 %v973_v26, %v972_v23 }
 0x6b6   : > { %v984_v56 = vsel %vm955_vm10, %v951_v29, 0.0  ;;  %v997_v59 = vadd.f32 %v996_v39, %v995_v42  ;;  %v2632_v29 = vld [vmem:[#allocation2] sm:$0xff] }
 0x6b7   : > { %v985_v36 = vrot.slane %v984_v56, 4  ;;  %v975_v40 = vrot.slane %v974_v35, 1 }
 0x6b9   : > { %v986_v52 = vadd.f32 %v985_v36, %v984_v56  ;;  %v976_v31 = vadd.f32 %v975_v40, %v974_v35  ;;  %v2636_v35 = vld [vmem:[#allocation2 + $0x30] sm:$0xff] }
 0x6ba   : > { %v2640_v40 = vld [vmem:[#allocation2 + $0x10] sm:$0xff] }
 0x6bb   : > { %v987_v32 = vrot.slane %v986_v52, 2  ;;  %1024 = vrot.lane.b32.xlu0 %v976_v31, %s2168_s8  ;;  %v940_v46 = vpop.permute.xlu0 %939  ;;  %v2644_v31 = vld [vmem:[#allocation2 + $0x28] sm:$0xff] }
 0x6bc   : > { %v953_v28 = vmul.f32 %v940_v46, %v2422_v55  ;;  %v1011_v55 = vadd.f32 %v1010_v62, %v1009_v45  ;;  %v2647_v46 = vld [vmem:[#allocation2 + $0x8] sm:$0xff] }
 0x6bd   : > { %v988_v50 = vadd.f32 %v987_v32, %v986_v52 }
 0x6be   : > { %v998_v54 = vsel %vm955_vm10, %v953_v28, 0.0 }
 0x6bf   : > { %v999_v57 = vrot.slane %v998_v54, 4  ;;  %v989_v41 = vrot.slane %v988_v50, 1 }
 0x6c1   : > { %v1000_v58 = vadd.f32 %v999_v57, %v998_v54  ;;  %v990_v47 = vadd.f32 %v989_v41, %v988_v50  ;;  %v2652_v50 = vld [vmem:[#allocation2 + $0x18] sm:$0xff]  ;;  %v2656_v57 = vld [vmem:[#allocation2 + $0x20] sm:$0xff] }
 0x6c3   : > { %v1001_v49 = vrot.slane %v1000_v58, 2  ;;  %1030 = vrot.lane.b32.xlu0 %v997_v59, %s2168_s8  ;;  %1028 = vrot.lane.b32.xlu2 %v990_v47, %s2168_s8 }
 0x6c5   : > { %v1002_v60 = vadd.f32 %v1001_v49, %v1000_v58  ;;  %v2660_v58 = vld [vmem:[#allocation2 + $0x38] sm:$0xff] }
 0x6c7   : > { %v1003_v0 = vrot.slane %v1002_v60, 1 }
 0x6c9   : > { %v1004_v43 = vadd.f32 %v1003_v0, %v1002_v60 }
 0x6cb   : > { %1034 = vrot.lane.b32.xlu0 %v1011_v55, %s2168_s8  ;;  %1032 = vrot.lane.b32.xlu2 %v1004_v43, %s2168_s8 }
 0x6f5   : > { %v1023_v2 = vpop.permute.xlu2 %1022 }
 0x6f6   : > { %v2593_v3 = vadd.f32 %v1023_v2, %v2476_v13 }
 0x6f8   : > { %v1053_v4 = vperm.slane %v2593_v3, 0 }
 0x6fa   : > { %1070 = vrot.lane.b32.xlu0 %v1053_v4, %s2169_s25 }
 0x715   : > { %v1027_v12 = vpop.permute.xlu1 %1026 }
 0x716   : > { %v2608_v15 = vadd.f32 %v1027_v12, %v2490_v33 }
 0x718   : > { %v1055_v18 = vperm.slane %v2608_v15, 0 }
 0x71d   : > { %v1029_v5 = vpop.permute.xlu2 %1028 }
 0x71e   : > { %v2598_v44 = vadd.f32 %v1029_v5, %v2506_v63 }
 0x720   : > { %v1056_v6 = vperm.slane %v2598_v44, 0 }
 0x722   : > { %1076 = vrot.lane.b32.xlu0 %v1056_v6, %s2169_s25 }
 0x725   : > { %v1021_v7 = vpop.permute.xlu0 %1020  ;;  %v1033_v20 = vpop.permute.xlu2 %1032 }
 0x726   : > { %v2603_v8 = vadd.f32 %v1021_v7, %v2478_v14  ;;  %v2618_v21 = vadd.f32 %v1033_v20, %v2516_v11 }
 0x728   : > { %v1052_v9 = vperm.slane %v2603_v8, 0  ;;  %v1058_v48 = vperm.slane %v2618_v21, 0 }
 0x72a   : > { %1068 = vrot.lane.b32.xlu2 %v1052_v9, %s2169_s25 }
 0x72d   : > { %v1025_v16 = vpop.permute.xlu0 %1024 }
 0x72e   : > { %v2611_v17 = vadd.f32 %v1025_v16, %v2492_v34 }
 0x730   : > { %v1054_v19 = vperm.slane %v2611_v17, 0 }
 0x732   : > { %1074 = vrot.lane.b32.xlu2 %v1055_v18, %s2169_s25  ;;  %1072 = vrot.lane.b32.xlu1 %v1054_v19, %s2169_s25 }
 0x735   : > { %v1031_v37 = vpop.permute.xlu0 %1030 }
 0x736   : > { %v2621_v22 = vadd.f32 %v1031_v37, %v2504_v61 }
 0x738   : > { %v1057_v23 = vperm.slane %v2621_v22, 0 }
 0x73a   : > { %1080 = vrot.lane.b32.xlu2 %v1058_v48, %s2169_s25  ;;  %1078 = vrot.lane.b32.xlu1 %v1057_v23, %s2169_s25 }
 0x73d   : > { %v1035_v24 = vpop.permute.xlu0 %1034 }
 0x73e   : > { %v2628_v25 = vadd.f32 %v1035_v24, %v2514_v10 }
 0x740   : > { %v1059_v26 = vperm.slane %v2628_v25, 0 }
 0x742   : > { %1082 = vrot.lane.b32.xlu0 %v1059_v26, %s2169_s25 }
 0x76c   : > { %v1071_v27 = vpop.permute.xlu0 %1070 }
 0x76d   : > { %v1093_v38 = vmul.f32 %v2632_v29, %v1071_v27 }
 0x76f   : > { %1110 = vrot.lane.b32.xlu2 %v1093_v38, %s2170_s29 }
 0x784   : > { %v1069_v30 = vpop.permute.xlu2 %1068 }
 0x785   : > { %v1092_v56 = vmul.f32 %v2636_v35, %v1069_v30 }
 0x787   : > { %1108 = vrot.lane.b32.xlu1 %v1092_v56, %s2170_s29 }
 0x78c   : > { %v1075_v36 = vpop.permute.xlu2 %1074 }
 0x78d   : > { %v1095_v42 = vmul.f32 %v2640_v40, %v1075_v36 }
 0x78f   : > { %1114 = vrot.lane.b32.xlu1 %v1095_v42, %s2170_s29 }
 0x794   : > { %v1081_v51 = vpop.permute.xlu2 %1080  ;;  %v1077_v52 = vpop.permute.xlu0 %1076 }
 0x795   : > { %v1098_v32 = vmul.f32 %v2644_v31, %v1081_v51  ;;  %v1096_v28 = vmul.f32 %v2647_v46, %v1077_v52 }
 0x797   : > { %1120 = vrot.lane.b32.xlu1 %v1098_v32, %s2170_s29  ;;  %1116 = vrot.lane.b32.xlu2 %v1096_v28, %s2170_s29 }
 0x7a4   : > { %v1073_v53 = vpop.permute.xlu1 %1072 }
 0x7a5   : > { %v1094_v39 = vmul.f32 %v2652_v50, %v1073_v53 }
 0x7a7   : > { %1112 = vrot.lane.b32.xlu0 %v1094_v39, %s2170_s29 }
 0x7ac   : > { %v1079_v54 = vpop.permute.xlu1 %1078 }
 0x7ad   : > { %v1097_v41 = vmul.f32 %v2656_v57, %v1079_v54 }
 0x7af   : > { %1118 = vrot.lane.b32.xlu0 %v1097_v41, %s2170_s29 }
 0x7b4   : > { %v1083_v45 = vpop.permute.xlu0 %1082 }
 0x7b5   : > { %v1099_v59 = vmul.f32 %v2660_v58, %v1083_v45 }
 0x7b7   : > { %1122 = vrot.lane.b32.xlu2 %v1099_v59, %s2170_s29 }
 0x7c9   : > { %v1111_v47 = vpop.permute.xlu2 %1110 }
 0x7ca   : > { %v1135_v49 = vsel %vm405_vm0, %v1111_v47, 0.0 }
 0x7cb   : > { %1136 = vadd.xlane.f32.xlu1 %v1135_v49 }
 0x7f1   : > { %v1117_v60 = vpop.permute.xlu2 %1116 }
 0x7f2   : > { %v1144_v62 = vsel %vm405_vm0, %v1117_v60, 0.0 }
 0x7f3   : > { %1145 = vadd.xlane.f32.xlu1 %v1144_v62 }
 0x7f9   : > { %v1109_v0 = vpop.permute.xlu1 %1108 }
 0x7fa   : > { %v1132_v55 = vsel %vm405_vm0, %v1109_v0, 0.0 }
 0x7fb   : > { %1133 = vadd.xlane.f32.xlu0 %v1132_v55 }
 0x801   : > { %v1115_v43 = vpop.permute.xlu1 %1114 }
 0x802   : > { %v1141_v2 = vsel %vm405_vm0, %v1115_v43, 0.0 }
 0x803   : > { %1142 = vadd.xlane.f32.xlu0 %v1141_v2 }
 0x809   : > { %v1121_v4 = vpop.permute.xlu1 %1120 }
 0x80a   : > { %v1150_v5 = vsel %vm405_vm0, %v1121_v4, 0.0 }
 0x80b   : > { %1151 = vadd.xlane.f32.xlu0 %v1150_v5 }
 0x811   : > { %v1123_v6 = vpop.permute.xlu2 %1122 }
 0x812   : > { %v1153_v7 = vsel %vm405_vm0, %v1123_v6, 0.0 }
 0x813   : > { %1154 = vadd.xlane.f32.xlu1 %v1153_v7 }
 0x819   : > { %v1113_v9 = vpop.permute.xlu0 %1112 }
 0x81a   : > { %v1138_v12 = vsel %vm405_vm0, %v1113_v9, 0.0 }
 0x81b   : > { %1139 = vadd.xlane.f32.xlu2 %v1138_v12 }
 0x821   : > { %v1119_v16 = vpop.permute.xlu0 %1118 }
 0x822   : > { %v1147_v18 = vsel %vm405_vm0, %v1119_v16, 0.0 }
 0x823   : > { %1148 = vadd.xlane.f32.xlu2 %v1147_v18 }
 0x83e   : > { %v1137_v20 = vpop.xlane.xlu1 %1136 }
 0x83f   : > { %v1165_v26 = vperm.slane %v1137_v20, %v2430_v1 }
 0x866   : > { %v1146_v23 = vpop.xlane.xlu1 %1145 }
 0x867   : > { %v1168_v51 = vperm.slane %v1146_v23, %v2430_v1 }
 0x86e   : > { %v1134_v19 = vpop.xlane.xlu0 %1133 }
 0x86f   : > { %v1164_v48 = vperm.slane %v1134_v19, %v2430_v1 }
 0x871   : > { %v1172_v38 = vsel %vm448_vm1, %v1165_v26, %v1164_v48 }
 0x876   : > { %v1143_v37 = vpop.xlane.xlu0 %1142 }
 0x877   : > { %v1167_v56 = vperm.slane %v1143_v37, %v2430_v1 }
 0x87e   : > { %v1152_v36 = vpop.xlane.xlu0 %1151 }
 0x87f   : > { %v1170_v53 = vperm.slane %v1152_v36, %v2430_v1 }
 0x886   : > { %v1155_v52 = vpop.xlane.xlu1 %1154 }
 0x887   : > { %v1171_v54 = vperm.slane %v1155_v52, %v2430_v1 }
 0x88e   : > { %v1140_v24 = vpop.xlane.xlu2 %1139 }
 0x88f   : > { %v1166_v27 = vperm.slane %v1140_v24, %v2430_v1 }
 0x891   : > { %v1173_v30 = vsel %vm450_vm2, %v1166_v27, %v1172_v38 }
 0x892   : > { %v1174_v42 = vsel %vm452_vm3, %v1167_v56, %v1173_v30 }
 0x893   : > { %v1175_v39 = vsel %vm454_vm4, %v1168_v51, %v1174_v42 }
 0x896   : > { %v1149_v32 = vpop.xlane.xlu2 %1148 }
 0x897   : > { %v1169_v28 = vperm.slane %v1149_v32, %v2430_v1 }
 0x899   : > { %v1176_v41 = vsel %vm456_vm5, %v1169_v28, %v1175_v39 }
 0x89a   : > { %v1177_v45 = vsel %vm458_vm6, %v1170_v53, %v1176_v41 }
 0x89b   : > { %v1178_v59 = vsel %vm460_vm7, %v1171_v54, %v1177_v45 }
 0x89c   : > { %v1180_v47 = vsel %vm463_vm8, %v1178_v59, -inf }
 0x89d   : > { %1181 = vmax.xlane.f32.xlu2 %v1180_v47 }
 0x910   : > { %v1182_v49 = vpop.xlane.xlu2 %1181 }
 0x911   : > { %v1186_v60 = vperm.slane %v1182_v49, 2  ;;  %v1185_v62 = vperm.slane %v1182_v49, 1  ;;  %v1184_v0 = vperm.slane %v1182_v49, 0  ;;  %v1189_v4 = vperm.slane %v1182_v49, 5 }
 0x912   : > { %v1188_v5 = vperm.slane %v1182_v49, 4  ;;  %v1187_v6 = vperm.slane %v1182_v49, 3  ;;  %v1191_v38 = vperm.slane %v1182_v49, 7 }
 0x913   : > { %v1202_v55 = vsub.f32 %v1140_v24, %v1186_v60  ;;  %v1201_v43 = vsub.f32 %v1137_v20, %v1185_v62  ;;  %v1200_v2 = vsub.f32 %v1134_v19, %v1184_v0  ;;  %v1205_v16 = vsub.f32 %v1149_v32, %v1189_v4 }
 0x914   : > { %v1204_v18 = vsub.f32 %v1146_v23, %v1188_v5  ;;  %v1203_v48 = vsub.f32 %v1143_v37, %v1187_v6  ;;  %v1190_v24 = vperm.slane %v1182_v49, 6  ;;  %v1207_v42 = vsub.f32 %v1155_v52, %v1191_v38 }
 0x915   : > { %v1212_v7 = vmul.f32 1.442695, %v1202_v55  ;;  %v1210_v9 = vmul.f32 1.442695, %v1201_v43  ;;  %v1208_v12 = vmul.f32 1.442695, %v1200_v2 }
 0x916   : > { %v1218_v26 = vmul.f32 1.442695, %v1205_v16  ;;  %v1216_v27 = vmul.f32 1.442695, %v1204_v18  ;;  %v1214_v56 = vmul.f32 1.442695, %v1203_v48  ;;  %v1206_v51 = vsub.f32 %v1152_v36, %v1190_v24 }
 0x917   : > { %1925 = vpow2.f32 %v1212_v7  ;;  %v1222_v32 = vmul.f32 1.442695, %v1207_v42 }
 0x918   : > { %1927 = vpow2.f32 %v1210_v9  ;;  %v1220_v28 = vmul.f32 1.442695, %v1206_v51 }
 0x919   : > { %1929 = vpow2.f32 %v1208_v12 }
 0x91a   : > { %1931 = vpow2.f32 %v1218_v26 }
 0x91b   : > { %1933 = vpow2.f32 %v1216_v27 }
 0x91c   : > { %1935 = vpow2.f32 %v1214_v56 }
 0x91d   : > { %v1926_v30 = vpop.eup %1925  ;;  %1937 = vpow2.f32 %v1222_v32 }
 0x91e   : > { %v1928_v20 = vpop.eup %1927  ;;  %1239 = vperm.xlu2 %1888, %v1926_v30   ;;  %1939 = vpow2.f32 %v1220_v28 }
 0x91f   : > { %v1930_v19 = vpop.eup %1929  ;;  %1236 = vperm.xlu1 %1887, %v1928_v20  }
 0x920   : > { %1233 = vperm.xlu0 %1886, %v1930_v19   ;;  %v1932_v23 = vpop.eup %1931 }
 0x921   : > { %v1934_v37 = vpop.eup %1933 }
 0x922   : > { %v1936_v53 = vpop.eup %1935 }
 0x923   : > { %v1938_v39 = vpop.eup %1937 }
 0x924   : > { %v1940_v54 = vpop.eup %1939 }
 0x926   : > { %1248 = vperm.xlu2 %1888, %v1932_v23  }
 0x927   : > { %1245 = vperm.xlu1 %1887, %v1934_v37  }
 0x928   : > { %1242 = vperm.xlu0 %1886, %v1936_v53  }
 0x92f   : > { %1254 = vperm.xlu1 %1887, %v1938_v39  }
 0x930   : > { %1251 = vperm.xlu0 %1886, %v1940_v54  }
 0x978   : > { %v1240_v59 = vpop.permute.xlu2 %1239 }
 0x979   : > { %v1258_v62 = vperm.slane %v1240_v59, %v2430_v1 }
 0x980   : > { %v1249_v4 = vpop.permute.xlu2 %1248 }
 0x981   : > { %v1261_v7 = vperm.slane %v1249_v4, %v2430_v1 }
 0x991   : > { %v1237_v41 = vpop.permute.xlu1 %1236 }
 0x992   : > { %v1234_v45 = vpop.permute.xlu0 %1233  ;;  %v1257_v52 = vperm.slane %v1237_v41, %v2430_v1 }
 0x993   : > { %v1256_v36 = vperm.slane %v1234_v45, %v2430_v1 }
 0x995   : > { %v1264_v49 = vsel %vm448_vm1, %v1257_v52, %v1256_v36 }
 0x996   : > { %v1265_v43 = vsel %vm450_vm2, %v1258_v62, %v1264_v49 }
 0x999   : > { %v1246_v47 = vpop.permute.xlu1 %1245 }
 0x99a   : > { %v1243_v60 = vpop.permute.xlu0 %1242  ;;  %v1260_v55 = vperm.slane %v1246_v47, %v2430_v1 }
 0x99b   : > { %v1259_v0 = vperm.slane %v1243_v60, %v2430_v1 }
 0x99d   : > { %v1266_v2 = vsel %vm452_vm3, %v1259_v0, %v1265_v43 }
 0x99e   : > { %v1267_v5 = vsel %vm454_vm4, %v1260_v55, %v1266_v2 }
 0x99f   : > { %v1268_v18 = vsel %vm456_vm5, %v1261_v7, %v1267_v5 }
 0x9a1   : > { %v1255_v6 = vpop.permute.xlu1 %1254 }
 0x9a2   : > { %v1263_v9 = vperm.slane %v1255_v6, %v2430_v1  ;;  %v1252_v12 = vpop.permute.xlu0 %1251 }
 0x9a3   : > { %v1262_v16 = vperm.slane %v1252_v12, %v2430_v1 }
 0x9a5   : > { %v1269_v48 = vsel %vm458_vm6, %v1262_v16, %v1268_v18 }
 0x9a6   : > { %v1270_v26 = vsel %vm460_vm7, %v1263_v9, %v1269_v48 }
 0x9a7   : > { %v1272_v27 = vsel %vm463_vm8, %v1270_v26, 0.0 }
 0x9a8   : > { %1273 = vadd.xlane.f32.xlu2 %v1272_v27 }
 0xa1b   : > { %v1274_v38 = vpop.xlane.xlu2 %1273 }
 0xa1c   : > { %1941 = vrcp.f32 %v1274_v38 }
 0xa22   : > { %v1942_v56 = vpop.eup %1941 }
 0xa23   : > { %v1279_v24 = vperm.slane %v1942_v56, 2  ;;  %v1278_v42 = vperm.slane %v1942_v56, 1  ;;  %v1280_v28 = vperm.slane %v1942_v56, 3  ;;  %v1277_v1 = vperm.slane %v1942_v56, 0 }
 0xa24   : > { %v1282_v59 = vperm.slane %v1942_v56, 5  ;;  %v1281_v52 = vperm.slane %v1942_v56, 4  ;;  %v1284_v49 = vperm.slane %v1942_v56, 7  ;;  %v1283_v60 = vperm.slane %v1942_v56, 6 }
 0xa25   : > { %v1295_v51 = vmul.f32 %v1926_v30, %v1279_v24  ;;  %v1294_v32 = vmul.f32 %v1928_v20, %v1278_v42  ;;  %v1296_v41 = vmul.f32 %v1936_v53, %v1280_v28  ;;  %v1293_v45 = vmul.f32 %v1930_v19, %v1277_v1 }
 0xa26   : > { %v1298_v36 = vmul.f32 %v1932_v23, %v1282_v59  ;;  %v1297_v47 = vmul.f32 %v1934_v37, %v1281_v52  ;;  %v1300_v62 = vmul.f32 %v1938_v39, %v1284_v49  ;;  %v1299_v0 = vmul.f32 %v1940_v54, %v1283_v60 }
 0xa27   : > { %1313 = vperm.xlu1 %1887, %v1295_v51   ;;  %1308 = vperm.xlu0 %1886, %v1294_v32  }
 0xa2f   : > { %1318 = vperm.xlu1 %1887, %v1296_v41   ;;  %1303 = vperm.xlu0 %1886, %v1293_v45  }
 0xa37   : > { %1328 = vperm.xlu1 %1887, %v1298_v36   ;;  %1323 = vperm.xlu0 %1886, %v1297_v47  }
 0xa3f   : > { %1338 = vperm.xlu1 %1887, %v1300_v62   ;;  %1333 = vperm.xlu0 %1886, %v1299_v0  }
 0xa99   : > { %v1314_v30 = vpop.permute.xlu1 %1313  ;;  %v1309_v20 = vpop.permute.xlu0 %1308 }
 0xa9a   : > { %v1343_v53 = vmul.f32 %v2652_v50, %v1314_v30  ;;  %v1342_v19 = vmul.f32 %v2632_v29, %v1309_v20 }
 0xa9c   : > { %v1364_v55 = vsel %vm1349_vm11, %v1343_v53, 0.0  ;;  %v1357_v23 = vsel %vm1349_vm11, %v1342_v19, 0.0 }
 0xa9d   : > { %v1365_v37 = vrot.slane %v1364_v55, 4  ;;  %v1358_v43 = vrot.slane %v1357_v23, 4 }
 0xa9f   : > { %v1366_v2 = vadd.f32 %v1365_v37, %v1364_v55  ;;  %v1359_v4 = vadd.f32 %v1358_v43, %v1357_v23 }
 0xaa1   : > { %v1367_v5 = vrot.slane %v1366_v2, 2  ;;  %v1360_v39 = vrot.slane %v1359_v4, 2  ;;  %v1319_v54 = vpop.permute.xlu1 %1318  ;;  %v1304_v6 = vpop.permute.xlu0 %1303 }
 0xaa2   : > { %v1344_v7 = vmul.f32 %v2640_v40, %v1319_v54  ;;  %v1341_v9 = vmul.f32 %v2636_v35, %v1304_v6 }
 0xaa3   : > { %v1368_v12 = vadd.f32 %v1367_v5, %v1366_v2  ;;  %v1361_v50 = vadd.f32 %v1360_v39, %v1359_v4 }
 0xaa4   : > { %v1371_v29 = vsel %vm1349_vm11, %v1344_v7, 0.0  ;;  %v1350_v16 = vsel %vm1349_vm11, %v1341_v9, 0.0 }
 0xaa5   : > { %v1372_v18 = vrot.slane %v1371_v29, 4  ;;  %v1351_v48 = vrot.slane %v1350_v16, 4  ;;  %v1369_v26 = vrot.slane %v1368_v12, 1  ;;  %v1362_v27 = vrot.slane %v1361_v50, 1 }
 0xaa7   : > { %v1373_v38 = vadd.f32 %v1372_v18, %v1371_v29  ;;  %v1352_v56 = vadd.f32 %v1351_v48, %v1350_v16  ;;  %v1370_v24 = vadd.f32 %v1369_v26, %v1368_v12  ;;  %v1363_v42 = vadd.f32 %v1362_v27, %v1361_v50 }
 0xaa8   : > { %v1472_v29 = vrot.slane %v2611_v17, 6 }
 0xaa9   : > { %v1374_v51 = vrot.slane %v1373_v38, 2  ;;  %v1353_v32 = vrot.slane %v1352_v56, 2  ;;  %1418 = vrot.lane.b32.xlu1 %v1370_v24, %s2170_s29  ;;  %v1329_v40 = vpop.permute.xlu1 %1328  ;;  %1416 = vrot.lane.b32.xlu0 %v1363_v42, %s2170_s29  ;;  %v1324_v35 = vpop.permute.xlu0 %1323  ;;  %v1474_v24 = vrot.slane %v2608_v15, 5 }
 0xaaa   : > { %v1346_v28 = vmul.f32 %v2656_v57, %v1329_v40  ;;  %v1345_v1 = vmul.f32 %v2647_v46, %v1324_v35  ;;  %v1476_v35 = vrot.slane %v2598_v44, 4 }
 0xaab   : > { %v1375_v41 = vadd.f32 %v1374_v51, %v1373_v38  ;;  %v1354_v45 = vadd.f32 %v1353_v32, %v1352_v56  ;;  %v1478_v32 = vrot.slane %v2621_v22, 3 }
 0xaac   : > { %v1385_v59 = vsel %vm1349_vm11, %v1346_v28, 0.0  ;;  %v1378_v52 = vsel %vm1349_vm11, %v1345_v1, 0.0  ;;  %v1482_v1 = vrot.slane %v2628_v25, 1 }
 0xaad   : > { %v1386_v36 = vrot.slane %v1385_v59, 4  ;;  %v1379_v47 = vrot.slane %v1378_v52, 4  ;;  %v1376_v49 = vrot.slane %v1375_v41, 1  ;;  %v1355_v60 = vrot.slane %v1354_v45, 1 }
 0xaaf   : > { %v1387_v62 = vadd.f32 %v1386_v36, %v1385_v59  ;;  %v1380_v0 = vadd.f32 %v1379_v47, %v1378_v52  ;;  %v1377_v30 = vadd.f32 %v1376_v49, %v1375_v41  ;;  %v1356_v20 = vadd.f32 %v1355_v60, %v1354_v45 }
 0xab0   : > { %v1480_v45 = vrot.slane %v2618_v21, 2 }
 0xab1   : > { %v1388_v53 = vrot.slane %v1387_v62, 2  ;;  %v1381_v19 = vrot.slane %v1380_v0, 2  ;;  %1420 = vrot.lane.b32.xlu2 %v1377_v30, %s2170_s29  ;;  %v1339_v57 = vpop.permute.xlu1 %1338  ;;  %1414 = vrot.lane.b32.xlu0 %v1356_v20, %s2170_s29  ;;  %v1334_v46 = vpop.permute.xlu0 %1333 }
 0xab2   : > { %v1348_v55 = vmul.f32 %v2660_v58, %v1339_v57  ;;  %v1347_v23 = vmul.f32 %v2644_v31, %v1334_v46  ;;  %v1470_v31 = vrot.slane %v2593_v3, 7 }
 0xab3   : > { %v1389_v37 = vadd.f32 %v1388_v53, %v1387_v62  ;;  %v1382_v43 = vadd.f32 %v1381_v19, %v1380_v0 }
 0xab4   : > { %v1399_v2 = vsel %vm1349_vm11, %v1348_v55, 0.0  ;;  %v1392_v4 = vsel %vm1349_vm11, %v1347_v23, 0.0  ;;  %v1471_v26 = vsel %vm448_vm1, %v1470_v31, %v2603_v8 }
 0xab5   : > { %v1400_v5 = vrot.slane %v1399_v2, 4  ;;  %v1393_v39 = vrot.slane %v1392_v4, 4  ;;  %v1390_v54 = vrot.slane %v1389_v37, 1  ;;  %v1383_v6 = vrot.slane %v1382_v43, 1 }
 0xab6   : > { %v1473_v27 = vsel %vm450_vm2, %v1472_v29, %v1471_v26 }
 0xab7   : > { %v1401_v7 = vadd.f32 %v1400_v5, %v1399_v2  ;;  %v1394_v9 = vadd.f32 %v1393_v39, %v1392_v4  ;;  %v1391_v12 = vadd.f32 %v1390_v54, %v1389_v37  ;;  %v1384_v50 = vadd.f32 %v1383_v6, %v1382_v43 }
 0xab8   : > { %v1475_v40 = vsel %vm452_vm3, %v1474_v24, %v1473_v27 }
 0xab9   : > { %v1402_v16 = vrot.slane %v1401_v7, 2  ;;  %v1395_v58 = vrot.slane %v1394_v9, 2  ;;  %1424 = vrot.lane.b32.xlu0 %v1391_v12, %s2170_s29  ;;  %1422 = vrot.lane.b32.xlu1 %v1384_v50, %s2170_s29  ;;  %v1477_v28 = vsel %vm454_vm4, %v1476_v35, %v1475_v40  ;;  %v1454_v12 = vsel %vm448_vm1, %v2476_v13, %v2478_v14 }
 0xaba   : > { %v1479_v41 = vsel %vm456_vm5, %v1478_v32, %v1477_v28 }
 0xabb   : > { %v1403_v18 = vadd.f32 %v1402_v16, %v1401_v7  ;;  %v1396_v48 = vadd.f32 %v1395_v58, %v1394_v9  ;;  %v1481_v59 = vsel %vm458_vm6, %v1480_v45, %v1479_v41 }
 0xabc   : > { %v1483_v52 = vsel %vm460_vm7, %v1482_v1, %v1481_v59 }
 0xabd   : > { %v1404_v38 = vrot.slane %v1403_v18, 1  ;;  %v1397_v56 = vrot.slane %v1396_v48, 1 }
 0xabf   : > { %v1405_v42 = vadd.f32 %v1404_v38, %v1403_v18  ;;  %v1398_v51 = vadd.f32 %v1397_v56, %v1396_v48 }
 0xac1   : > { %1428 = vrot.lane.b32.xlu0 %v1405_v42, %s2170_s29  ;;  %1426 = vrot.lane.b32.xlu1 %v1398_v51, %s2170_s29 }
 0xac9   : > { %1484 = vrot.lane.b32.xlu1 %v1483_v52, %s2169_s25 }
 0xb0b   : > { %v1421_v0 = vpop.permute.xlu2 %1420 }
 0xb0c   : > { %v1441_v46 = vadd.f32 %v1421_v0, %v2608_v15 }
 0xb0e   : > { %v1499_v2 = vrot.slane %v1441_v46, 5 }
 0xb1b   : > { %v1417_v36 = vpop.permute.xlu0 %1416  ;;  %v1419_v47 = vpop.permute.xlu1 %1418 }
 0xb1c   : > { %v1439_v60 = vadd.f32 %v1417_v36, %v2593_v3  ;;  %v1440_v30 = vadd.f32 %v1419_v47, %v2611_v17 }
 0xb1e   : > { %v1495_v20 = vrot.slane %v1439_v60, 7  ;;  %v1497_v23 = vrot.slane %v1440_v30, 6 }
 0xb23   : > { %v1415_v49 = vpop.permute.xlu0 %1414 }
 0xb24   : > { %v1438_v62 = vadd.f32 %v1415_v49, %v2603_v8 }
 0xb26   : > { %v1496_v55 = vsel %vm448_vm1, %v1495_v20, %v1438_v62 }
 0xb27   : > { %v1498_v43 = vsel %vm450_vm2, %v1497_v23, %v1496_v55 }
 0xb28   : > { %v1500_v8 = vsel %vm452_vm3, %v1499_v2, %v1498_v43 }
 0xb2b   : > { %v1423_v53 = vpop.permute.xlu1 %1422  ;;  %v1425_v19 = vpop.permute.xlu0 %1424 }
 0xb2c   : > { %v1442_v57 = vadd.f32 %v1423_v53, %v2598_v44  ;;  %v1443_v37 = vadd.f32 %v1425_v19, %v2621_v22 }
 0xb2e   : > { %v1501_v3 = vrot.slane %v1442_v57, 4  ;;  %v1503_v4 = vrot.slane %v1443_v37, 3 }
 0xb30   : > { %v1502_v39 = vsel %vm454_vm4, %v1501_v3, %v1500_v8 }
 0xb31   : > { %v1504_v7 = vsel %vm456_vm5, %v1503_v4, %v1502_v39 }
 0xb33   : > { %v1427_v17 = vpop.permute.xlu1 %1426  ;;  %v1429_v5 = vpop.permute.xlu0 %1428 }
 0xb34   : > { %v1444_v44 = vadd.f32 %v1427_v17, %v2618_v21  ;;  %v1445_v15 = vadd.f32 %v1429_v5, %v2628_v25  ;;  %v1455_v21 = vsel %vm450_vm2, %v2492_v34, %v1454_v12 }
 0xb35   : > { %v1456_v25 = vsel %vm452_vm3, %v2490_v33, %v1455_v21 }
 0xb36   : > { %v1505_v54 = vrot.slane %v1444_v44, 2  ;;  %v1507_v6 = vrot.slane %v1445_v15, 1  ;;  %v1457_v50 = vsel %vm454_vm4, %v2506_v63, %v1456_v25 }
 0xb37   : > { %v1458_v29 = vsel %vm456_vm5, %v2504_v61, %v1457_v50 }
 0xb38   : > { %v1506_v22 = vsel %vm458_vm6, %v1505_v54, %v1504_v7  ;;  %v1459_v16 = vsel %vm458_vm6, %v2516_v11, %v1458_v29 }
 0xb39   : > { %v1508_v9 = vsel %vm460_vm7, %v1507_v6, %v1506_v22  ;;  %v1460_v58 = vsel %vm460_vm7, %v2514_v10, %v1459_v16 }
 0xb3a   : > { %1509 = vrot.lane.b32.xlu0 %v1508_v9, %s2170_s29  ;;  %v1512_v14 = vsel %vm405_vm0, 0.0, %v1460_v58 }
 0xb3b   : > { %v1485_v13 = vpop.permute.xlu1 %1484 }
 0xb3c   : > { %v1514_v34 = vsel %vm1513_vm12, %v1512_v14, %v1485_v13 }
 0xbac   : > { %v1510_v31 = vpop.permute.xlu0 %1509 }
 0xbad   : > { %v1516_v33 = vsel %vm1515_vm13, %v1514_v34, %v1510_v31 }
 0xbae   : > { %1517 = vst [vmem:[%s221_s3] sm:$0xff] %v1516_v33 }
 0xbaf PF: > { %s2880_s27 = sld [smem:[#allocation13_spill]]  ;;  %s1531_s0 = sshll.u32 %s221_s3, 4  ;;  %s1532_s0 = int_to_ptr.vmem [resolvable:$true] %s1531_s0 }
 0xbb0   : > { %s2881_s18 = sld [smem:[#allocation19_spill]]  ;;  %s1519_s12 = scalar_lea.sflag [#allocation5], %s219_s23 }
 0xbb5   : > { %s1706_s28 = sshll.u32 %s2880_s27, 3 }
 0xbb6   : > { %s2882_s24 = smov %s2881_s18  ;;  %s1529_s19 = scalar_lea.hbm %s2881_s18, %s1706_s28 }
 0xbb7   : > { %s1533_s21 = sshll.u32 %s1529_s19, 4  ;;  %s2031_s27 = scalar_lea.hbm %s2882_s24, 16  ;;  %s1534_s21 = int_to_ptr.hbm [resolvable:$true] %s1533_s21 }
 0xbb8   : > { %s2025_s26 = sshra.s32 %s1534_s21, 4  ;;  %s2026_s26 = int_to_ptr.hbm [resolvable:$true] %s2025_s26 }
 0xbb9   : > { %s2027_s8 = scalar_lea.hbm %s2026_s26, 8  ;;  %p2032_p9 = scmp.lt.s32.totalorder %s2026_s26, %s2882_s24 }
 0xbba   : > { %p2028_p3 = scmp.ne.s32.totalorder %s2026_s26, %s2027_s8  ;;  %p2033_p10 = scmp.lt.s32.totalorder %s2031_s27, %s2027_s8 }
 0xbbc   : > { %p2029_p4 = pnand %p2028_p3, %p2342_p5  ;;  %p2034_p11 = por %p2033_p10, %p2032_p9 }
 0xbbe   : > { %p2030_p8 = pneg %p2029_p4 }
 0xbc0   : > { %p2035_p6 = pnand %p2034_p11, %p2030_p8 }
 0xbc2   : > { %2038 = shalt.err (!%p2035_p6)
}
 0xbc3   : > { %1751 = dma.vmem_to_hbm [thread:$0]  (%p2342_p5), %s1532_s0, 128, %s1534_s21, %s1519_s12  }
 0xbc4 PF: > { %p1765_p12 = scmp.ge.s32.totalorder %s2161_s22, 2  ;;  %s1545_s23 = sand.u32 1, %s2109_s9  }
 0xbc5   : > { %s1546_s1 = scalar_lea.sflag [#allocation5], %s1545_s23 }
 0xbc6   : > { %p1761_p2 = pnand %p1765_p12, %p2348_p7 }
 0xbc8   : > { %p1762_p0 = pneg %p1761_p2 }
 0xbca   : > { %2104 = dma.done.wait (%p1762_p0), %s1546_s1, 128  }
 0xbcb   : > { %2106 = vsyncadd (%p1762_p0), %s1546_s1, 4294967168  ;;  %s21_s22 = sadd.s32 1, %s2161_s22   ;;  %s2884_s19 = sld [smem:[#allocation14_spill]] }
 0xbcc   : > { %p2801_p13 = scmp.ge.s32.totalorder %s21_s22, 10   ;;  %s2885_s7 = sld [smem:[#allocation15_spill]] }
 0xbcd   : > { %s2886_s21 = sld [smem:[#allocation16_spill]]  ;;  %s2887_s9 = smov %s2113_s10 }
 0xbce   : > { %s2888_s10 = smov %s2117_s11  ;;  %s2889_s11 = smov %s2287_s4 }
 0xbcf   : > { %s2890_s12 = smov %s2125_s13  ;;  %s2891_s13 = smov %s2129_s14 }
 0xbd0   : > { %s2892_s14 = smov %s2315_s30  ;;  %s2893_s15 = smov %s2137_s16 }
 0xbd1   : > { %s2894_s16 = smov %s2141_s17  ;;  %s2895_s17 = smov %s2290_s5 }
 0xbd2   : > { %s2896_s18 = smov %s2153_s20  ;;  %s2897_s20 = smov %s2885_s7 }
 0xbd3   :  { %20 = sbr.rel (!%p2801_p13) target bundleno = 16 (0x10), region = 94 }
 0xbd8   :  { %1552 = vsyncpa [#allocation4], 1 }
 0xbd9   :  { %1554 = vsyncpa [#allocation4 + $0x1], 1 }
 0xbda   :  { %1555 = vsyncpa [#allocation7], 1 }
 0xbdb   :  { %1557 = vsyncpa [#allocation7 + $0x1], 1 }
 0xbdc   :  { %1558 = vsyncpa [#allocation5], 1 }
 0xbdd   :  { %1560 = vsyncpa [#allocation5 + $0x1], 1 }

</bundles_post_ra>
